<compile_context>
chip_gen: v5e
topology: v5e:2x2
jax: 0.10.0
libtpu: 0.0.40
codegen_flags: <defaults>
</compile_context>

<pallas_src>
import functools

import jax
import jax.numpy as jnp
from jax.experimental import pallas as pl
from jax.experimental.pallas import tpu as pltpu


# ----------------------------------------------------------------------------
# Kernel: embedding gather + input projection + fused 4-stream BiLSTM.
# ----------------------------------------------------------------------------
def _siamese_bilstm_kernel(tok_ref, table_ref, wih_ref, whh_ref, b_ref,
                           out_ref, gx_ref, *, seq_len: int, batch: int,
                           hidden: int):
    S, B, H = seq_len, batch, hidden
    rows = tok_ref.shape[0]        # 2*S*B token rows, ordered (time, branch, batch)
    vpad = table_ref.shape[0]      # stacked (emb1 | emb2) vocab rows, lane-padded

    # --- Phase 1: embedding gather for BOTH branches as one one-hot matmul. --
    tok = tok_ref[...]                                            # (2SB, 1) int32
    iota = jax.lax.broadcasted_iota(jnp.int32, (rows, vpad), 1)
    onehot = (tok == iota).astype(jnp.float32)                    # (2SB, vpad)
    emb = jnp.dot(onehot, table_ref[...],
                  preferred_element_type=jnp.float32)             # (2SB, E)

    # --- Phase 2: hoisted input projection, both directions, all timesteps. --
    # wih_ref = [Wih_fwd | Wih_bwd] on lanes; b_ref = (b_ih + b_hh) likewise.
    gx_ref[...] = (jnp.dot(emb, wih_ref[...],
                           preferred_element_type=jnp.float32)
                   + b_ref[...])                                  # (2SB, 8H)

    # --- Phase 3: fused recurrence over 4 streams {fwd,bwd} x {br1,br2}. -----
    whh = whh_ref[...]                                            # (H, 8H) = [Whh_f | Whh_b]
    # row layout of h/c: [fwd_br1 (0:B) | fwd_br2 (B:2B) | bwd_br1 | bwd_br2]
    h = jnp.zeros((4 * B, H), jnp.float32)
    c = jnp.zeros((4 * B, H), jnp.float32)

    # S is small & static -> fully unrolled.  (Use lax.fori_loop if S grows.)
    for t in range(S):
        tb = S - 1 - t
        # one recurrent matmul for all four streams
        rec = jnp.dot(h, whh, preferred_element_type=jnp.float32)   # (4B, 8H)
        # gx rows at a given time hold [branch1 | branch2] contiguously;
        # fwd streams read lanes 0:4H at time t, bwd streams lanes 4H:8H at S-1-t.
        gates = jnp.concatenate(
            [gx_ref[2 * B * t:2 * B * (t + 1), 0:4 * H]
             + rec[0:2 * B, 0:4 * H],
             gx_ref[2 * B * tb:2 * B * (tb + 1), 4 * H:8 * H]
             + rec[2 * B:4 * B, 4 * H:8 * H]],
            axis=0)                                 # (4B, 4H), PyTorch order i,f,g,o
        sig = jax.nn.sigmoid(gates)                 # i/f/o: one full-width EUP pass
        g_g = jnp.tanh(gates[:, 2 * H:3 * H])       # tanh only on the g-gate slice
        i_g = sig[:, 0:H]
        f_g = sig[:, H:2 * H]
        o_g = sig[:, 3 * H:4 * H]
        c = f_g * c + i_g * g_g
        h = o_g * jnp.tanh(c)

    # --- Phase 4: lane-dense (B, 4H) = (8, 128) store: [state1 | state2]. ----
    # state_i = cat(h_fwd_final_i, h_bwd_final_i, dim=-1)
    out_ref[...] = jnp.concatenate(
        [h[0:B], h[2 * B:3 * B], h[B:2 * B], h[3 * B:4 * B]], axis=-1)


# ----------------------------------------------------------------------------
# Wrapper: token permute/stack + weight packing (one-time prep) + pallas_call.
# ----------------------------------------------------------------------------
def siamese_forward(tokens1, tokens2, params):
    B, S = tokens1.shape
    vocab, E = params["embedding1"].shape
    H = params["whh_f"].shape[0]

    # inputs.permute(1, 0): (B, S) -> (S, B); branch-2 tokens are offset by
    # `vocab` so a single stacked table serves both branches.  Row order of the
    # flattened token vector is (time, branch, batch) so per-timestep slices in
    # the kernel are contiguous.
    tok1 = tokens1.T.astype(jnp.int32)                      # (S, B)
    tok2 = tokens2.T.astype(jnp.int32) + vocab              # (S, B)
    tok_all = jnp.stack([tok1, tok2], axis=1).reshape(2 * S * B, 1)

    # Stacked embedding table, rows padded to a lane-aligned contraction dim.
    vpad = max(128, pl.cdiv(2 * vocab, 128) * 128)
    big_table = jnp.concatenate(
        [params["embedding1"], params["embedding2"]], axis=0).astype(jnp.float32)
    big_table = jnp.pad(big_table, ((0, vpad - 2 * vocab), (0, 0)))

    # Weight packing (in a real deployment this is one-time preprocessing).
    wih_cat = jnp.concatenate([params["wih_f"], params["wih_b"]], axis=1)  # (E, 8H)
    whh_cat = jnp.concatenate([params["whh_f"], params["whh_b"]], axis=1)  # (H, 8H)
    b_cat = jnp.concatenate([params["b_f"], params["b_b"]], axis=1)        # (1, 8H)

    # No grid: every array is a full-size VMEM-resident block (total < 256 KB,
    # far under the scoped VMEM limit on v5e/v6e/v7x).
    out = pl.pallas_call(
        functools.partial(_siamese_bilstm_kernel,
                          seq_len=S, batch=B, hidden=H),
        out_shape=jax.ShapeDtypeStruct((B, 4 * H), jnp.float32),
        scratch_shapes=[pltpu.VMEM((2 * S * B, 8 * H), jnp.float32)],
    )(tok_all, big_table, wih_cat, whh_cat, b_cat)

    return out[:, :2 * H], out[:, 2 * H:]                   # (state1, state2)


# ----------------------------------------------------------------------------
# Pure-JAX reference (mirrors PyTorch nn.LSTM, bidirectional, eval dropout).
# ----------------------------------------------------------------------------
def ref_forward(tokens1, tokens2, params, hidden):
    H = hidden

    def lstm_dir(emb, wih, whh, b):
        B = emb.shape[1]

        def step(carry, x):
            h, c = carry
            gates = x @ wih + h @ whh + b
            i = jax.nn.sigmoid(gates[:, :H])
            f = jax.nn.sigmoid(gates[:, H:2 * H])
            g = jnp.tanh(gates[:, 2 * H:3 * H])
            o = jax.nn.sigmoid(gates[:, 3 * H:])
            c2 = f * c + i * g
            h2 = o * jnp.tanh(c2)
            return (h2, c2), None

        init = (jnp.zeros((B, H), jnp.float32), jnp.zeros((B, H), jnp.float32))
        (h_fin, _), _ = jax.lax.scan(step, init, emb)
        return h_fin

    def encode(tokens, emb_table):
        emb = jnp.take(emb_table, tokens.T, axis=0).astype(jnp.float32)
        hf = lstm_dir(emb, params["wih_f"], params["whh_f"], params["b_f"])
        hb = lstm_dir(emb[::-1], params["wih_b"], params["whh_b"], params["b_b"])
        return jnp.concatenate([hf, hb], axis=-1)

    return (encode(tokens1, params["embedding1"]),
            encode(tokens2, params["embedding2"]))


if __name__ == "__main__":
    # module config: emb_dim=32, vocab_size=50, units(hidden)=32, num_layers=1,
    # rnn='lstm', bidirectional, shared weights, eval-mode dropout.
    vocab_size, emb_dim, hidden_size = 50, 32, 32
    batch, seq = 8, 8

    key = jax.random.PRNGKey(0)
    keys = jax.random.split(key, 12)

    def init(k, shape, scale=0.1):
        return (scale * jax.random.normal(k, shape)).astype(jnp.float32)

    H, E = hidden_size, emb_dim
    params = {
        "embedding1": init(keys[0], (vocab_size, E), 1.0),
        "embedding2": init(keys[1], (vocab_size, E), 1.0),
        # PyTorch stores (4H, E)/(4H, H); kept pre-transposed for x @ W.
        "wih_f": init(keys[2], (E, 4 * H)),
        "whh_f": init(keys[3], (H, 4 * H)),
        "b_f": init(keys[4], (1, 4 * H)),       # b_ih + b_hh combined, forward
        "wih_b": init(keys[5], (E, 4 * H)),
        "whh_b": init(keys[6], (H, 4 * H)),
        "b_b": init(keys[7], (1, 4 * H)),       # b_ih + b_hh combined, backward
    }

    tokens1 = jax.random.randint(keys[8], (batch, seq), 0, vocab_size, dtype=jnp.int32)
    tokens2 = jax.random.randint(keys[9], (batch, seq), 0, vocab_size, dtype=jnp.int32)

    forward = jax.jit(siamese_forward)
    state1, state2 = forward(tokens1, tokens2, params)
    state1 = jax.block_until_ready(state1)
    state2 = jax.block_until_ready(state2)

    ref1, ref2 = ref_forward(tokens1, tokens2, params, hidden_size)
    ref1 = jax.block_until_ready(ref1)
    ref2 = jax.block_until_ready(ref2)

    assert state1.shape == (batch, 2 * hidden_size)
    assert state2.shape == (batch, 2 * hidden_size)
    assert jnp.allclose(state1, ref1, rtol=1e-4, atol=1e-5), (state1, ref1)
    assert jnp.allclose(state2, ref2, rtol=1e-4, atol=1e-5), (state2, ref2)

    print("KERNEL_OK")
</pallas_src>

<mosaic_0001>
module attributes {stable_mosaic.version = 11 : i64} {
  func.func @_siamese_bilstm_kernel(%arg0: memref<128x1xi32, #tpu.memory_space<vmem>>, %arg1: memref<128x32xf32, #tpu.memory_space<vmem>>, %arg2: memref<32x256xf32, #tpu.memory_space<vmem>>, %arg3: memref<32x256xf32, #tpu.memory_space<vmem>>, %arg4: memref<1x256xf32, #tpu.memory_space<vmem>>, %arg5: memref<8x128xf32, #tpu.memory_space<vmem>>, %arg6: memref<128x256xf32, #tpu.memory_space<vmem>>) attributes {dimension_semantics = [], scalar_prefetch = 0 : i64, scratch_operands = 1 : i64, tpu.core_type = #tpu.core_type<tc>} {
    %c0 = arith.constant 0 : index
    %c0_0 = arith.constant 0 : index
    %0 = vector.load %arg0[%c0, %c0_0] : memref<128x1xi32, #tpu.memory_space<vmem>>, vector<128x1xi32>
    %1 = tpu.iota {dimensions = array<i32: 1>} : vector<128x128xi32>
    %2 = vector.broadcast %0 : vector<128x1xi32> to vector<128x128xi32>
    %3 = arith.cmpi eq, %2, %1 : vector<128x128xi32>
    %4 = arith.extui %3 : vector<128x128xi1> to vector<128x128xi32>
    %5 = arith.sitofp %4 : vector<128x128xi32> to vector<128x128xf32>
    %c0_1 = arith.constant 0 : index
    %c0_2 = arith.constant 0 : index
    %6 = vector.load %arg1[%c0_1, %c0_2] : memref<128x32xf32, #tpu.memory_space<vmem>>, vector<128x32xf32>
    %cst = arith.constant dense<0.000000e+00> : vector<128x32xf32>
    %7 = tpu.matmul %5, %6, %cst {dimension_numbers = #tpu.dot_dimension_numbers<[1], [0], [0], [1], [0, 0, 1, 1], [], []>} : vector<128x128xf32>, vector<128x32xf32>, vector<128x32xf32> -> vector<128x32xf32>
    %c0_3 = arith.constant 0 : index
    %c0_4 = arith.constant 0 : index
    %8 = vector.load %arg2[%c0_3, %c0_4] : memref<32x256xf32, #tpu.memory_space<vmem>>, vector<32x256xf32>
    %cst_5 = arith.constant dense<0.000000e+00> : vector<128x256xf32>
    %9 = tpu.matmul %7, %8, %cst_5 {dimension_numbers = #tpu.dot_dimension_numbers<[1], [0], [0], [1], [0, 0, 1, 1], [], []>} : vector<128x32xf32>, vector<32x256xf32>, vector<128x256xf32> -> vector<128x256xf32>
    %c0_6 = arith.constant 0 : index
    %c0_7 = arith.constant 0 : index
    %10 = vector.load %arg4[%c0_6, %c0_7] : memref<1x256xf32, #tpu.memory_space<vmem>>, vector<1x256xf32>
    %11 = vector.broadcast %10 : vector<1x256xf32> to vector<128x256xf32>
    %12 = arith.addf %9, %11 : vector<128x256xf32>
    %c0_8 = arith.constant 0 : index
    %c0_9 = arith.constant 0 : index
    %13 = vector.load %arg6[%c0_8, %c0_9] : memref<128x256xf32, #tpu.memory_space<vmem>>, vector<128x256xf32>
    tpu.vector_store %arg6[%c0_8, %c0_9], %12 {strides = array<i32>} : memref<128x256xf32, #tpu.memory_space<vmem>>, vector<128x256xf32>,
    %c0_10 = arith.constant 0 : index
    %c0_11 = arith.constant 0 : index
    %14 = vector.load %arg3[%c0_10, %c0_11] : memref<32x256xf32, #tpu.memory_space<vmem>>, vector<32x256xf32>
    %cst_12 = arith.constant 0.000000e+00 : f32
    %15 = vector.broadcast %cst_12 : f32 to vector<32x32xf32>
    %cst_13 = arith.constant 0.000000e+00 : f32
    %16 = vector.broadcast %cst_13 : f32 to vector<32x32xf32>
    %cst_14 = arith.constant dense<0.000000e+00> : vector<32x256xf32>
    %17 = tpu.matmul %15, %14, %cst_14 {dimension_numbers = #tpu.dot_dimension_numbers<[1], [0], [0], [1], [0, 0, 1, 1], [], []>} : vector<32x32xf32>, vector<32x256xf32>, vector<32x256xf32> -> vector<32x256xf32>
    %c0_15 = arith.constant 0 : index
    %c0_16 = arith.constant 0 : index
    %18 = vector.load %arg6[%c0_15, %c0_16] : memref<128x256xf32, #tpu.memory_space<vmem>>, vector<16x128xf32>
    %19 = vector.extract_strided_slice %17 {offsets = [0, 0], sizes = [16, 128], strides = [1, 1]} : vector<32x256xf32> to vector<16x128xf32>
    %20 = arith.addf %18, %19 : vector<16x128xf32>
    %c112 = arith.constant 112 : index
    %c128 = arith.constant 128 : index
    %21 = vector.load %arg6[%c112, %c128] : memref<128x256xf32, #tpu.memory_space<vmem>>, vector<16x128xf32>
    %22 = vector.extract_strided_slice %17 {offsets = [16, 128], sizes = [16, 128], strides = [1, 1]} : vector<32x256xf32> to vector<16x128xf32>
    %23 = arith.addf %21, %22 : vector<16x128xf32>
    %24 = tpu.concatenate %20, %23 in 0 : vector<16x128xf32>, vector<16x128xf32> -> vector<32x128xf32>
    %25 = arith.negf %24 : vector<32x128xf32>
    %26 = math.exp %25 : vector<32x128xf32>
    %cst_17 = arith.constant 1.000000e+00 : f32
    %27 = vector.broadcast %cst_17 : f32 to vector<32x128xf32>
    %28 = arith.addf %27, %26 : vector<32x128xf32>
    %29 = arith.divf %27, %28 : vector<32x128xf32>
    %30 = vector.extract_strided_slice %24 {offsets = [0, 64], sizes = [32, 32], strides = [1, 1]} : vector<32x128xf32> to vector<32x32xf32>
    %31 = math.tanh %30 : vector<32x32xf32>
    %32 = vector.extract_strided_slice %29 {offsets = [0, 0], sizes = [32, 32], strides = [1, 1]} : vector<32x128xf32> to vector<32x32xf32>
    %33 = vector.extract_strided_slice %29 {offsets = [0, 32], sizes = [32, 32], strides = [1, 1]} : vector<32x128xf32> to vector<32x32xf32>
    %34 = vector.extract_strided_slice %29 {offsets = [0, 96], sizes = [32, 32], strides = [1, 1]} : vector<32x128xf32> to vector<32x32xf32>
    %35 = arith.mulf %33, %16 : vector<32x32xf32>
    %36 = arith.mulf %32, %31 : vector<32x32xf32>
    %37 = arith.addf %35, %36 : vector<32x32xf32>
    %38 = math.tanh %37 : vector<32x32xf32>
    %39 = arith.mulf %34, %38 : vector<32x32xf32>
    %cst_18 = arith.constant dense<0.000000e+00> : vector<32x256xf32>
    %40 = tpu.matmul %39, %14, %cst_18 {dimension_numbers = #tpu.dot_dimension_numbers<[1], [0], [0], [1], [0, 0, 1, 1], [], []>} : vector<32x32xf32>, vector<32x256xf32>, vector<32x256xf32> -> vector<32x256xf32>
    %c16 = arith.constant 16 : index
    %c0_19 = arith.constant 0 : index
    %41 = vector.load %arg6[%c16, %c0_19] : memref<128x256xf32, #tpu.memory_space<vmem>>, vector<16x128xf32>
    %42 = vector.extract_strided_slice %40 {offsets = [0, 0], sizes = [16, 128], strides = [1, 1]} : vector<32x256xf32> to vector<16x128xf32>
    %43 = arith.addf %41, %42 : vector<16x128xf32>
    %c96 = arith.constant 96 : index
    %c128_20 = arith.constant 128 : index
    %44 = vector.load %arg6[%c96, %c128_20] : memref<128x256xf32, #tpu.memory_space<vmem>>, vector<16x128xf32>
    %45 = vector.extract_strided_slice %40 {offsets = [16, 128], sizes = [16, 128], strides = [1, 1]} : vector<32x256xf32> to vector<16x128xf32>
    %46 = arith.addf %44, %45 : vector<16x128xf32>
    %47 = tpu.concatenate %43, %46 in 0 : vector<16x128xf32>, vector<16x128xf32> -> vector<32x128xf32>
    %48 = arith.negf %47 : vector<32x128xf32>
    %49 = math.exp %48 : vector<32x128xf32>
    %cst_21 = arith.constant 1.000000e+00 : f32
    %50 = vector.broadcast %cst_21 : f32 to vector<32x128xf32>
    %51 = arith.addf %50, %49 : vector<32x128xf32>
    %52 = arith.divf %50, %51 : vector<32x128xf32>
    %53 = vector.extract_strided_slice %47 {offsets = [0, 64], sizes = [32, 32], strides = [1, 1]} : vector<32x128xf32> to vector<32x32xf32>
    %54 = math.tanh %53 : vector<32x32xf32>
    %55 = vector.extract_strided_slice %52 {offsets = [0, 0], sizes = [32, 32], strides = [1, 1]} : vector<32x128xf32> to vector<32x32xf32>
    %56 = vector.extract_strided_slice %52 {offsets = [0, 32], sizes = [32, 32], strides = [1, 1]} : vector<32x128xf32> to vector<32x32xf32>
    %57 = vector.extract_strided_slice %52 {offsets = [0, 96], sizes = [32, 32], strides = [1, 1]} : vector<32x128xf32> to vector<32x32xf32>
    %58 = arith.mulf %56, %37 : vector<32x32xf32>
    %59 = arith.mulf %55, %54 : vector<32x32xf32>
    %60 = arith.addf %58, %59 : vector<32x32xf32>
    %61 = math.tanh %60 : vector<32x32xf32>
    %62 = arith.mulf %57, %61 : vector<32x32xf32>
    %cst_22 = arith.constant dense<0.000000e+00> : vector<32x256xf32>
    %63 = tpu.matmul %62, %14, %cst_22 {dimension_numbers = #tpu.dot_dimension_numbers<[1], [0], [0], [1], [0, 0, 1, 1], [], []>} : vector<32x32xf32>, vector<32x256xf32>, vector<32x256xf32> -> vector<32x256xf32>
    %c32 = arith.constant 32 : index
    %c0_23 = arith.constant 0 : index
    %64 = vector.load %arg6[%c32, %c0_23] : memref<128x256xf32, #tpu.memory_space<vmem>>, vector<16x128xf32>
    %65 = vector.extract_strided_slice %63 {offsets = [0, 0], sizes = [16, 128], strides = [1, 1]} : vector<32x256xf32> to vector<16x128xf32>
    %66 = arith.addf %64, %65 : vector<16x128xf32>
    %c80 = arith.constant 80 : index
    %c128_24 = arith.constant 128 : index
    %67 = vector.load %arg6[%c80, %c128_24] : memref<128x256xf32, #tpu.memory_space<vmem>>, vector<16x128xf32>
    %68 = vector.extract_strided_slice %63 {offsets = [16, 128], sizes = [16, 128], strides = [1, 1]} : vector<32x256xf32> to vector<16x128xf32>
    %69 = arith.addf %67, %68 : vector<16x128xf32>
    %70 = tpu.concatenate %66, %69 in 0 : vector<16x128xf32>, vector<16x128xf32> -> vector<32x128xf32>
    %71 = arith.negf %70 : vector<32x128xf32>
    %72 = math.exp %71 : vector<32x128xf32>
    %cst_25 = arith.constant 1.000000e+00 : f32
    %73 = vector.broadcast %cst_25 : f32 to vector<32x128xf32>
    %74 = arith.addf %73, %72 : vector<32x128xf32>
    %75 = arith.divf %73, %74 : vector<32x128xf32>
    %76 = vector.extract_strided_slice %70 {offsets = [0, 64], sizes = [32, 32], strides = [1, 1]} : vector<32x128xf32> to vector<32x32xf32>
    %77 = math.tanh %76 : vector<32x32xf32>
    %78 = vector.extract_strided_slice %75 {offsets = [0, 0], sizes = [32, 32], strides = [1, 1]} : vector<32x128xf32> to vector<32x32xf32>
    %79 = vector.extract_strided_slice %75 {offsets = [0, 32], sizes = [32, 32], strides = [1, 1]} : vector<32x128xf32> to vector<32x32xf32>
    %80 = vector.extract_strided_slice %75 {offsets = [0, 96], sizes = [32, 32], strides = [1, 1]} : vector<32x128xf32> to vector<32x32xf32>
    %81 = arith.mulf %79, %60 : vector<32x32xf32>
    %82 = arith.mulf %78, %77 : vector<32x32xf32>
    %83 = arith.addf %81, %82 : vector<32x32xf32>
    %84 = math.tanh %83 : vector<32x32xf32>
    %85 = arith.mulf %80, %84 : vector<32x32xf32>
    %cst_26 = arith.constant dense<0.000000e+00> : vector<32x256xf32>
    %86 = tpu.matmul %85, %14, %cst_26 {dimension_numbers = #tpu.dot_dimension_numbers<[1], [0], [0], [1], [0, 0, 1, 1], [], []>} : vector<32x32xf32>, vector<32x256xf32>, vector<32x256xf32> -> vector<32x256xf32>
    %c48 = arith.constant 48 : index
    %c0_27 = arith.constant 0 : index
    %87 = vector.load %arg6[%c48, %c0_27] : memref<128x256xf32, #tpu.memory_space<vmem>>, vector<16x128xf32>
    %88 = vector.extract_strided_slice %86 {offsets = [0, 0], sizes = [16, 128], strides = [1, 1]} : vector<32x256xf32> to vector<16x128xf32>
    %89 = arith.addf %87, %88 : vector<16x128xf32>
    %c64 = arith.constant 64 : index
    %c128_28 = arith.constant 128 : index
    %90 = vector.load %arg6[%c64, %c128_28] : memref<128x256xf32, #tpu.memory_space<vmem>>, vector<16x128xf32>
    %91 = vector.extract_strided_slice %86 {offsets = [16, 128], sizes = [16, 128], strides = [1, 1]} : vector<32x256xf32> to vector<16x128xf32>
    %92 = arith.addf %90, %91 : vector<16x128xf32>
    %93 = tpu.concatenate %89, %92 in 0 : vector<16x128xf32>, vector<16x128xf32> -> vector<32x128xf32>
    %94 = arith.negf %93 : vector<32x128xf32>
    %95 = math.exp %94 : vector<32x128xf32>
    %cst_29 = arith.constant 1.000000e+00 : f32
    %96 = vector.broadcast %cst_29 : f32 to vector<32x128xf32>
    %97 = arith.addf %96, %95 : vector<32x128xf32>
    %98 = arith.divf %96, %97 : vector<32x128xf32>
    %99 = vector.extract_strided_slice %93 {offsets = [0, 64], sizes = [32, 32], strides = [1, 1]} : vector<32x128xf32> to vector<32x32xf32>
    %100 = math.tanh %99 : vector<32x32xf32>
    %101 = vector.extract_strided_slice %98 {offsets = [0, 0], sizes = [32, 32], strides = [1, 1]} : vector<32x128xf32> to vector<32x32xf32>
    %102 = vector.extract_strided_slice %98 {offsets = [0, 32], sizes = [32, 32], strides = [1, 1]} : vector<32x128xf32> to vector<32x32xf32>
    %103 = vector.extract_strided_slice %98 {offsets = [0, 96], sizes = [32, 32], strides = [1, 1]} : vector<32x128xf32> to vector<32x32xf32>
    %104 = arith.mulf %102, %83 : vector<32x32xf32>
    %105 = arith.mulf %101, %100 : vector<32x32xf32>
    %106 = arith.addf %104, %105 : vector<32x32xf32>
    %107 = math.tanh %106 : vector<32x32xf32>
    %108 = arith.mulf %103, %107 : vector<32x32xf32>
    %cst_30 = arith.constant dense<0.000000e+00> : vector<32x256xf32>
    %109 = tpu.matmul %108, %14, %cst_30 {dimension_numbers = #tpu.dot_dimension_numbers<[1], [0], [0], [1], [0, 0, 1, 1], [], []>} : vector<32x32xf32>, vector<32x256xf32>, vector<32x256xf32> -> vector<32x256xf32>
    %c64_31 = arith.constant 64 : index
    %c0_32 = arith.constant 0 : index
    %110 = vector.load %arg6[%c64_31, %c0_32] : memref<128x256xf32, #tpu.memory_space<vmem>>, vector<16x128xf32>
    %111 = vector.extract_strided_slice %109 {offsets = [0, 0], sizes = [16, 128], strides = [1, 1]} : vector<32x256xf32> to vector<16x128xf32>
    %112 = arith.addf %110, %111 : vector<16x128xf32>
    %c48_33 = arith.constant 48 : index
    %c128_34 = arith.constant 128 : index
    %113 = vector.load %arg6[%c48_33, %c128_34] : memref<128x256xf32, #tpu.memory_space<vmem>>, vector<16x128xf32>
    %114 = vector.extract_strided_slice %109 {offsets = [16, 128], sizes = [16, 128], strides = [1, 1]} : vector<32x256xf32> to vector<16x128xf32>
    %115 = arith.addf %113, %114 : vector<16x128xf32>
    %116 = tpu.concatenate %112, %115 in 0 : vector<16x128xf32>, vector<16x128xf32> -> vector<32x128xf32>
    %117 = arith.negf %116 : vector<32x128xf32>
    %118 = math.exp %117 : vector<32x128xf32>
    %cst_35 = arith.constant 1.000000e+00 : f32
    %119 = vector.broadcast %cst_35 : f32 to vector<32x128xf32>
    %120 = arith.addf %119, %118 : vector<32x128xf32>
    %121 = arith.divf %119, %120 : vector<32x128xf32>
    %122 = vector.extract_strided_slice %116 {offsets = [0, 64], sizes = [32, 32], strides = [1, 1]} : vector<32x128xf32> to vector<32x32xf32>
    %123 = math.tanh %122 : vector<32x32xf32>
    %124 = vector.extract_strided_slice %121 {offsets = [0, 0], sizes = [32, 32], strides = [1, 1]} : vector<32x128xf32> to vector<32x32xf32>
    %125 = vector.extract_strided_slice %121 {offsets = [0, 32], sizes = [32, 32], strides = [1, 1]} : vector<32x128xf32> to vector<32x32xf32>
    %126 = vector.extract_strided_slice %121 {offsets = [0, 96], sizes = [32, 32], strides = [1, 1]} : vector<32x128xf32> to vector<32x32xf32>
    %127 = arith.mulf %125, %106 : vector<32x32xf32>
    %128 = arith.mulf %124, %123 : vector<32x32xf32>
    %129 = arith.addf %127, %128 : vector<32x32xf32>
    %130 = math.tanh %129 : vector<32x32xf32>
    %131 = arith.mulf %126, %130 : vector<32x32xf32>
    %cst_36 = arith.constant dense<0.000000e+00> : vector<32x256xf32>
    %132 = tpu.matmul %131, %14, %cst_36 {dimension_numbers = #tpu.dot_dimension_numbers<[1], [0], [0], [1], [0, 0, 1, 1], [], []>} : vector<32x32xf32>, vector<32x256xf32>, vector<32x256xf32> -> vector<32x256xf32>
    %c80_37 = arith.constant 80 : index
    %c0_38 = arith.constant 0 : index
    %133 = vector.load %arg6[%c80_37, %c0_38] : memref<128x256xf32, #tpu.memory_space<vmem>>, vector<16x128xf32>
    %134 = vector.extract_strided_slice %132 {offsets = [0, 0], sizes = [16, 128], strides = [1, 1]} : vector<32x256xf32> to vector<16x128xf32>
    %135 = arith.addf %133, %134 : vector<16x128xf32>
    %c32_39 = arith.constant 32 : index
    %c128_40 = arith.constant 128 : index
    %136 = vector.load %arg6[%c32_39, %c128_40] : memref<128x256xf32, #tpu.memory_space<vmem>>, vector<16x128xf32>
    %137 = vector.extract_strided_slice %132 {offsets = [16, 128], sizes = [16, 128], strides = [1, 1]} : vector<32x256xf32> to vector<16x128xf32>
    %138 = arith.addf %136, %137 : vector<16x128xf32>
    %139 = tpu.concatenate %135, %138 in 0 : vector<16x128xf32>, vector<16x128xf32> -> vector<32x128xf32>
    %140 = arith.negf %139 : vector<32x128xf32>
    %141 = math.exp %140 : vector<32x128xf32>
    %cst_41 = arith.constant 1.000000e+00 : f32
    %142 = vector.broadcast %cst_41 : f32 to vector<32x128xf32>
    %143 = arith.addf %142, %141 : vector<32x128xf32>
    %144 = arith.divf %142, %143 : vector<32x128xf32>
    %145 = vector.extract_strided_slice %139 {offsets = [0, 64], sizes = [32, 32], strides = [1, 1]} : vector<32x128xf32> to vector<32x32xf32>
    %146 = math.tanh %145 : vector<32x32xf32>
    %147 = vector.extract_strided_slice %144 {offsets = [0, 0], sizes = [32, 32], strides = [1, 1]} : vector<32x128xf32> to vector<32x32xf32>
    %148 = vector.extract_strided_slice %144 {offsets = [0, 32], sizes = [32, 32], strides = [1, 1]} : vector<32x128xf32> to vector<32x32xf32>
    %149 = vector.extract_strided_slice %144 {offsets = [0, 96], sizes = [32, 32], strides = [1, 1]} : vector<32x128xf32> to vector<32x32xf32>
    %150 = arith.mulf %148, %129 : vector<32x32xf32>
    %151 = arith.mulf %147, %146 : vector<32x32xf32>
    %152 = arith.addf %150, %151 : vector<32x32xf32>
    %153 = math.tanh %152 : vector<32x32xf32>
    %154 = arith.mulf %149, %153 : vector<32x32xf32>
    %cst_42 = arith.constant dense<0.000000e+00> : vector<32x256xf32>
    %155 = tpu.matmul %154, %14, %cst_42 {dimension_numbers = #tpu.dot_dimension_numbers<[1], [0], [0], [1], [0, 0, 1, 1], [], []>} : vector<32x32xf32>, vector<32x256xf32>, vector<32x256xf32> -> vector<32x256xf32>
    %c96_43 = arith.constant 96 : index
    %c0_44 = arith.constant 0 : index
    %156 = vector.load %arg6[%c96_43, %c0_44] : memref<128x256xf32, #tpu.memory_space<vmem>>, vector<16x128xf32>
    %157 = vector.extract_strided_slice %155 {offsets = [0, 0], sizes = [16, 128], strides = [1, 1]} : vector<32x256xf32> to vector<16x128xf32>
    %158 = arith.addf %156, %157 : vector<16x128xf32>
    %c16_45 = arith.constant 16 : index
    %c128_46 = arith.constant 128 : index
    %159 = vector.load %arg6[%c16_45, %c128_46] : memref<128x256xf32, #tpu.memory_space<vmem>>, vector<16x128xf32>
    %160 = vector.extract_strided_slice %155 {offsets = [16, 128], sizes = [16, 128], strides = [1, 1]} : vector<32x256xf32> to vector<16x128xf32>
    %161 = arith.addf %159, %160 : vector<16x128xf32>
    %162 = tpu.concatenate %158, %161 in 0 : vector<16x128xf32>, vector<16x128xf32> -> vector<32x128xf32>
    %163 = arith.negf %162 : vector<32x128xf32>
    %164 = math.exp %163 : vector<32x128xf32>
    %cst_47 = arith.constant 1.000000e+00 : f32
    %165 = vector.broadcast %cst_47 : f32 to vector<32x128xf32>
    %166 = arith.addf %165, %164 : vector<32x128xf32>
    %167 = arith.divf %165, %166 : vector<32x128xf32>
    %168 = vector.extract_strided_slice %162 {offsets = [0, 64], sizes = [32, 32], strides = [1, 1]} : vector<32x128xf32> to vector<32x32xf32>
    %169 = math.tanh %168 : vector<32x32xf32>
    %170 = vector.extract_strided_slice %167 {offsets = [0, 0], sizes = [32, 32], strides = [1, 1]} : vector<32x128xf32> to vector<32x32xf32>
    %171 = vector.extract_strided_slice %167 {offsets = [0, 32], sizes = [32, 32], strides = [1, 1]} : vector<32x128xf32> to vector<32x32xf32>
    %172 = vector.extract_strided_slice %167 {offsets = [0, 96], sizes = [32, 32], strides = [1, 1]} : vector<32x128xf32> to vector<32x32xf32>
    %173 = arith.mulf %171, %152 : vector<32x32xf32>
    %174 = arith.mulf %170, %169 : vector<32x32xf32>
    %175 = arith.addf %173, %174 : vector<32x32xf32>
    %176 = math.tanh %175 : vector<32x32xf32>
    %177 = arith.mulf %172, %176 : vector<32x32xf32>
    %cst_48 = arith.constant dense<0.000000e+00> : vector<32x256xf32>
    %178 = tpu.matmul %177, %14, %cst_48 {dimension_numbers = #tpu.dot_dimension_numbers<[1], [0], [0], [1], [0, 0, 1, 1], [], []>} : vector<32x32xf32>, vector<32x256xf32>, vector<32x256xf32> -> vector<32x256xf32>
    %c112_49 = arith.constant 112 : index
    %c0_50 = arith.constant 0 : index
    %179 = vector.load %arg6[%c112_49, %c0_50] : memref<128x256xf32, #tpu.memory_space<vmem>>, vector<16x128xf32>
    %180 = vector.extract_strided_slice %178 {offsets = [0, 0], sizes = [16, 128], strides = [1, 1]} : vector<32x256xf32> to vector<16x128xf32>
    %181 = arith.addf %179, %180 : vector<16x128xf32>
    %c0_51 = arith.constant 0 : index
    %c128_52 = arith.constant 128 : index
    %182 = vector.load %arg6[%c0_51, %c128_52] : memref<128x256xf32, #tpu.memory_space<vmem>>, vector<16x128xf32>
    %183 = vector.extract_strided_slice %178 {offsets = [16, 128], sizes = [16, 128], strides = [1, 1]} : vector<32x256xf32> to vector<16x128xf32>
    %184 = arith.addf %182, %183 : vector<16x128xf32>
    %185 = tpu.concatenate %181, %184 in 0 : vector<16x128xf32>, vector<16x128xf32> -> vector<32x128xf32>
    %186 = arith.negf %185 : vector<32x128xf32>
    %187 = math.exp %186 : vector<32x128xf32>
    %cst_53 = arith.constant 1.000000e+00 : f32
    %188 = vector.broadcast %cst_53 : f32 to vector<32x128xf32>
    %189 = arith.addf %188, %187 : vector<32x128xf32>
    %190 = arith.divf %188, %189 : vector<32x128xf32>
    %191 = vector.extract_strided_slice %185 {offsets = [0, 64], sizes = [32, 32], strides = [1, 1]} : vector<32x128xf32> to vector<32x32xf32>
    %192 = math.tanh %191 : vector<32x32xf32>
    %193 = vector.extract_strided_slice %190 {offsets = [0, 0], sizes = [32, 32], strides = [1, 1]} : vector<32x128xf32> to vector<32x32xf32>
    %194 = vector.extract_strided_slice %190 {offsets = [0, 32], sizes = [32, 32], strides = [1, 1]} : vector<32x128xf32> to vector<32x32xf32>
    %195 = vector.extract_strided_slice %190 {offsets = [0, 96], sizes = [32, 32], strides = [1, 1]} : vector<32x128xf32> to vector<32x32xf32>
    %196 = arith.mulf %194, %175 : vector<32x32xf32>
    %197 = arith.mulf %193, %192 : vector<32x32xf32>
    %198 = arith.addf %196, %197 : vector<32x32xf32>
    %199 = math.tanh %198 : vector<32x32xf32>
    %200 = arith.mulf %195, %199 : vector<32x32xf32>
    %201 = vector.extract_strided_slice %200 {offsets = [0, 0], sizes = [8, 32], strides = [1, 1]} : vector<32x32xf32> to vector<8x32xf32>
    %202 = vector.extract_strided_slice %200 {offsets = [16, 0], sizes = [8, 32], strides = [1, 1]} : vector<32x32xf32> to vector<8x32xf32>
    %203 = vector.extract_strided_slice %200 {offsets = [8, 0], sizes = [8, 32], strides = [1, 1]} : vector<32x32xf32> to vector<8x32xf32>
    %204 = vector.extract_strided_slice %200 {offsets = [24, 0], sizes = [8, 32], strides = [1, 1]} : vector<32x32xf32> to vector<8x32xf32>
    %205 = tpu.concatenate %201, %202, %203, %204 in 1 : vector<8x32xf32>, vector<8x32xf32>, vector<8x32xf32>, vector<8x32xf32> -> vector<8x128xf32>
    %c0_54 = arith.constant 0 : index
    %c0_55 = arith.constant 0 : index
    %206 = vector.load %arg5[%c0_54, %c0_55] : memref<8x128xf32, #tpu.memory_space<vmem>>, vector<8x128xf32>
    tpu.vector_store %arg5[%c0_54, %c0_55], %205 {strides = array<i32>} : memref<8x128xf32, #tpu.memory_space<vmem>>, vector<8x128xf32>,
    return
  }
}

</mosaic_0001>

<bundles_post_ra>
// kernel: siamese_forward.1
= control target key start
LH: loop header
LB: loop body
LE: loop exit
PB: predicated region body
PF: predicated region fallthrough
CT: control target
= control target key end

     0   :  { %v2726_v0 = vmov 0   ;;  %v36_v33 = vlaneseq  ;;  %v2727_v36 = vmov 1.0   ;;  %v2728_v55 = vmov 0.0   ;;  %s2730_s11 = smov 32   ;;  %s3613_s0 = inlined_call_operand.vmem [shape: s32[128,1], index: 0, kind: input, shape index: {}]   ;;  %s3614_s1 = inlined_call_operand.vmem [shape: f32[128,32], index: 1, kind: input, shape index: {}]   ;;  %s3615_s3 = inlined_call_operand.vmem [shape: f32[32,256], index: 3, kind: input, shape index: {}]   ;;  %s3616_s2 = inlined_call_operand.vmem [shape: f32[32,256], index: 2, kind: input, shape index: {}]   ;;  %s3617_s4 = inlined_call_operand.vmem [shape: f32[1,256], index: 4, kind: input, shape index: {}]   ;;  %s3618_s5 = inlined_call_operand.vmem [shape: f32[8,128], index: 5, kind: output, shape index: {}]  }
   0x1   :  { %2460 = vset.pattern.permute.xlu1 %v2726_v0  ;;  %2459 = vset.pattern.permute.xlu0 %v2726_v0  ;;  %v22_v1 = vld [vmem:[%s3613_s0 + $0x10] sm:$0xff]  ;;  %v20_v2 = vld [vmem:[%s3613_s0] sm:$0xff]  ;;  %v23_v4 = vld [vmem:[%s3613_s0 + $0x18] sm:$0xff] }
   0x2   :  { %45 = vperm.xlu1 %2460, %v22_v1   ;;  %39 = vperm.xlu0 %2459, %v20_v2   ;;  %v24_v3 = vld [vmem:[%s3613_s0 + $0x20] sm:$0xff]  ;;  %v21_v5 = vld [vmem:[%s3613_s0 + $0x8] sm:$0xff]  ;;  %v149_v7 = vld [vmem:[%s3614_s1 + $0x78] sm:$0xff]  ;;  %v2858_v34 = vand.u32 127, %v36_v33 }
   0x3   :  { %2461 = vset.pattern.permute.xlu2 %v2726_v0  ;;  %v25_v6 = vld [vmem:[%s3613_s0 + $0x28] sm:$0xff]  ;;  %150 = vmatpush.msra.mxu0 %v149_v7  ;;  %v148_v8 = vld [vmem:[%s3614_s1 + $0x70] sm:$0xff]  ;;  %v146_v10 = vld [vmem:[%s3614_s1 + $0x60] sm:$0xff] }
   0x4   :  { %51 = vperm.xlu2 %2461, %v24_v3   ;;  %v147_v9 = vld [vmem:[%s3614_s1 + $0x68] sm:$0xff]  ;;  %v27_v11 = vld [vmem:[%s3613_s0 + $0x38] sm:$0xff]  ;;  %v26_v12 = vld [vmem:[%s3613_s0 + $0x30] sm:$0xff] }
   0x5   :  { %151 = vmatpush.msra.mxu0 %v148_v8  ;;  %v145_v13 = vld [vmem:[%s3614_s1 + $0x58] sm:$0xff]  ;;  %v28_v14 = vld [vmem:[%s3613_s0 + $0x40] sm:$0xff]  ;;  %v144_v15 = vld [vmem:[%s3614_s1 + $0x50] sm:$0xff] }
   0x6   :  { %v143_v16 = vld [vmem:[%s3614_s1 + $0x48] sm:$0xff]  ;;  %v142_v17 = vld [vmem:[%s3614_s1 + $0x40] sm:$0xff]  ;;  %v30_v18 = vld [vmem:[%s3613_s0 + $0x50] sm:$0xff] }
   0x7   :  { %152 = vmatpush.msra.mxu0 %v147_v9  ;;  %v29_v19 = vld [vmem:[%s3613_s0 + $0x48] sm:$0xff]  ;;  %v141_v20 = vld [vmem:[%s3614_s1 + $0x38] sm:$0xff]  ;;  %v140_v22 = vld [vmem:[%s3614_s1 + $0x30] sm:$0xff] }
   0x8   :  { %v31_v21 = vld [vmem:[%s3613_s0 + $0x58] sm:$0xff]  ;;  %v139_v23 = vld [vmem:[%s3614_s1 + $0x28] sm:$0xff]  ;;  %v138_v24 = vld [vmem:[%s3614_s1 + $0x20] sm:$0xff] }
   0x9   :  { %153 = vmatpush.msra.mxu0 %v146_v10  ;;  %v33_v25 = vld [vmem:[%s3613_s0 + $0x68] sm:$0xff]  ;;  %v32_v26 = vld [vmem:[%s3613_s0 + $0x60] sm:$0xff]  ;;  %v137_v27 = vld [vmem:[%s3614_s1 + $0x18] sm:$0xff] }
   0xa   :  { %48 = vperm.xlu1 %2460, %v23_v4   ;;  %42 = vperm.xlu0 %2459, %v21_v5   ;;  %v34_v28 = vld [vmem:[%s3613_s0 + $0x70] sm:$0xff]  ;;  %v135_v30 = vld [vmem:[%s3614_s1 + $0x8] sm:$0xff]  ;;  %v35_v31 = vld [vmem:[%s3613_s0 + $0x78] sm:$0xff] }
   0xb   :  { %154 = vmatpush.msra.mxu0 %v145_v13  ;;  %v136_v29 = vld [vmem:[%s3614_s1 + $0x10] sm:$0xff]  ;;  %v134_v32 = vld [vmem:[%s3614_s1] sm:$0xff]  ;;  %v222_v9 = vld [vmem:[%s3616_s2 + $0x38] sm:$0xff] }
   0xc   :  { %54 = vperm.xlu2 %2461, %v25_v6   ;;  %v2885_v47 = vld [vmem:[%s3615_s3 + $0x30] sm:$0xff]  ;;  %v2890_v48 = vld [vmem:[%s3615_s3 + $0x20] sm:$0xff]  ;;  %v220_v10 = vld [vmem:[%s3616_s2 + $0x28] sm:$0xff] }
   0xd   :  { %155 = vmatpush.msra.mxu0 %v144_v15  ;;  %v221_v49 = vld [vmem:[%s3616_s2 + $0x30] sm:$0xff]  ;;  %463 = vmatpush.msra.mxu3 %v2885_v47  ;;  %v219_v52 = vld [vmem:[%s3616_s2 + $0x20] sm:$0xff]  ;;  %v3038_v33 = vld [vmem:[%s3615_s3 + $0x18] sm:$0xff] }
   0xe   :  { %290 = vmatpush.msra.mxu1 %v221_v49  ;;  %v2899_v50 = vld [vmem:[%s3615_s3 + $0x10] sm:$0xff]  ;;  %2445 = vmatpush.msra.mxu2 %v221_v49  ;;  %v2911_v53 = vld [vmem:[%s3615_s3] sm:$0xff] }
   0xf   :  { %156 = vmatpush.msra.mxu0 %v143_v16  ;;  %464 = vmatpush.msra.mxu3 %v2890_v48  ;;  %v217_v54 = vld [vmem:[%s3616_s2 + $0x10] sm:$0xff]  ;;  %v215_v57 = vld [vmem:[%s3616_s2] sm:$0xff] }
  0x10   :  { %291 = vmatpush.msra.mxu1 %v219_v52  ;;  %2446 = vmatpush.msra.mxu2 %v219_v52 }
  0x11   :  { %157 = vmatpush.msra.mxu0 %v142_v17  ;;  %465 = vmatpush.msra.mxu3 %v2899_v50 }
  0x12   :  { %60 = vperm.xlu1 %2460, %v27_v11   ;;  %57 = vperm.xlu0 %2459, %v26_v12   ;;  %v218_v11 = vld [vmem:[%s3616_s2 + $0x18] sm:$0xff]  ;;  %v216_v12 = vld [vmem:[%s3616_s2 + $0x8] sm:$0xff] }
  0x13   :  { %158 = vmatpush.msra.mxu0 %v141_v20  ;;  %466 = vmatpush.msra.mxu3 %v2911_v53  ;;  %v2995_v20 = vld [vmem:[%s3617_s4] sm:$0x3]  ;;  %s2729_s4 = smov 64  }
  0x14   :  { %63 = vperm.xlu2 %2461, %v28_v14   ;;  %467 = vmatmul.f32.vlgmr.msra.gmra.mxu3 %v2728_v55 }
  0x15   :  { %159 = vmatpush.msra.mxu0 %v140_v22  ;;  %292 = vmatpush.msra.mxu1 %v217_v54  ;;  %v3000_v22 = vperm.slane %v2995_v20, 0 }
  0x16   :  { %2447 = vmatpush.msra.mxu2 %v217_v54 }
  0x17   :  { %160 = vmatpush.msra.mxu0 %v139_v23  ;;  %293 = vmatpush.msra.mxu1 %v215_v57 }
  0x18   :  { %2448 = vmatpush.msra.mxu2 %v215_v57 }
  0x19   :  { %161 = vmatpush.msra.mxu0 %v138_v24  ;;  %923 = vmatpush.msrb.mxu1 %v2885_v47 }
  0x1a   :  { %69 = vperm.xlu1 %2460, %v30_v18   ;;  %66 = vperm.xlu0 %2459, %v29_v19  }
  0x1b   :  { %162 = vmatpush.msra.mxu0 %v137_v27  ;;  %924 = vmatpush.msrb.mxu1 %v2890_v48 }
  0x1c   :  { %72 = vperm.xlu2 %2461, %v31_v21   ;;  %470 = vmatmul.f32.gmra.mxu3 %v2728_v55 }
  0x1d   :  { %163 = vmatpush.msra.mxu0 %v136_v29  ;;  %925 = vmatpush.msrb.mxu1 %v2899_v50 }
  0x1e   :  { %355 = vmatpush.msrb.mxu2 %v222_v9 }
  0x1f   :  { %164 = vmatpush.msra.mxu0 %v135_v30  ;;  %926 = vmatpush.msrb.mxu1 %v2911_v53 }
  0x20   :  { %356 = vmatpush.msrb.mxu2 %v220_v10 }
  0x21   :  { %165 = vmatpush.msra.mxu0 %v134_v32  ;;  %v3027_v32 = vld [vmem:[%s3615_s3 + $0x28] sm:$0xff] }
  0x22   :  { %78 = vperm.xlu1 %2460, %v33_v25   ;;  %75 = vperm.xlu0 %2459, %v32_v26  }
  0x23   :  { %357 = vmatpush.msrb.mxu2 %v218_v11 }
  0x24   :  { %81 = vperm.xlu2 %2461, %v34_v28   ;;  %473 = vmatmul.f32.gmra.mxu3 %v2728_v55 }
  0x25   :  { %358 = vmatpush.msrb.mxu2 %v216_v12 }
  0x2a   :  { %84 = vperm.xlu0 %2459, %v35_v31   ;;  %v3017_v31 = vld [vmem:[%s3615_s3 + $0x38] sm:$0xff] }
  0x2b   :  { %490 = vmatpush.msrb.mxu3 %v3017_v31  ;;  %1180 = vmatpush.msrb.mxu0 %v3017_v31 }
  0x2c   :  { %475 = vmatmul.f32.gmra.mxu3 %v2728_v55 }
  0x2d   :  { %491 = vmatpush.msrb.mxu3 %v3027_v32  ;;  %1181 = vmatpush.msrb.mxu0 %v3027_v32 }
  0x2f   :  { %492 = vmatpush.msrb.mxu3 %v3038_v33  ;;  %1182 = vmatpush.msrb.mxu0 %v3038_v33 }
  0x5e   :  { %v52_v40 = vpop.permute.xlu2 %51 }
  0x5f   :  { %vm90_vm4 = vcmp.eq.s32.totalorder %v52_v40, %v2858_v34 }
  0x66   :  { %v55_v41 = vpop.permute.xlu2 %54 }
  0x67   :  { %vm91_vm5 = vcmp.eq.s32.totalorder %v55_v41, %v2858_v34 }
  0x6e   :  { %v64_v44 = vpop.permute.xlu2 %63 }
  0x6f   :  { %vm94_vm8 = vcmp.eq.s32.totalorder %v64_v44, %v2858_v34 }
  0x74   :  { %v40_v35 = vpop.permute.xlu0 %39  ;;  %v46_v38 = vpop.permute.xlu1 %45 }
  0x75   :  { %vm86_vm0 = vcmp.eq.s32.totalorder %v40_v35, %v2858_v34  ;;  %vm88_vm2 = vcmp.eq.s32.totalorder %v46_v38, %v2858_v34 }
  0x76   :  { %2309 = vmatmul.msk.f32.vlgmr.msra.gmra.mxu0 %vm86_vm0, %v2727_v36  ;;  %v73_v51 = vpop.permute.xlu2 %72  ;;  %vm229_vm0 = vcmask 261120  }
  0x77   :  { %vm97_vm11 = vcmp.eq.s32.totalorder %v73_v51, %v2858_v34 }
  0x7c   :  { %v43_v37 = vpop.permute.xlu0 %42  ;;  %v49_v39 = vpop.permute.xlu1 %48 }
  0x7d   :  { %vm87_vm1 = vcmp.eq.s32.totalorder %v43_v37, %v2858_v34  ;;  %vm89_vm3 = vcmp.eq.s32.totalorder %v49_v39, %v2858_v34 }
  0x7e   :  { %2310 = vmatmul.msk.f32.gmra.mxu0 %vm87_vm1, %v2727_v36  ;;  %v82_v59 = vpop.permute.xlu2 %81 }
  0x7f   :  { %vm100_vm14 = vcmp.eq.s32.totalorder %v82_v59, %v2858_v34 }
  0x84   :  { %v58_v42 = vpop.permute.xlu0 %57  ;;  %v61_v43 = vpop.permute.xlu1 %60 }
  0x85   :  { %vm92_vm6 = vcmp.eq.s32.totalorder %v58_v42, %v2858_v34  ;;  %vm93_vm7 = vcmp.eq.s32.totalorder %v61_v43, %v2858_v34 }
  0x86   :  { %2311 = vmatmul.msk.f32.gmra.mxu0 %vm88_vm2, %v2727_v36 }
  0x8c   :  { %v67_v45 = vpop.permute.xlu0 %66  ;;  %v70_v46 = vpop.permute.xlu1 %69 }
  0x8d   :  { %vm95_vm9 = vcmp.eq.s32.totalorder %v67_v45, %v2858_v34  ;;  %vm96_vm10 = vcmp.eq.s32.totalorder %v70_v46, %v2858_v34 }
  0x8e   :  { %2312 = vmatmul.msk.f32.gmra.mxu0 %vm89_vm3, %v2727_v36 }
  0x94   :  { %v76_v56 = vpop.permute.xlu0 %75  ;;  %v79_v58 = vpop.permute.xlu1 %78 }
  0x95   :  { %vm98_vm12 = vcmp.eq.s32.totalorder %v76_v56, %v2858_v34  ;;  %vm99_vm13 = vcmp.eq.s32.totalorder %v79_v58, %v2858_v34 }
  0x96   :  { %2313 = vmatmul.msk.f32.gmra.mxu0 %vm90_vm4, %v2727_v36 }
  0x97   :  { %v468_v14 = vpop.f32.mrf.mxu3 }
  0x9c   :  { %v85_v60 = vpop.permute.xlu0 %84 }
  0x9d   :  { %vm101_vm15 = vcmp.eq.s32.totalorder %v85_v60, %v2858_v34  ;;  %v3049_v34 = vld [vmem:[%s3615_s3 + $0x8] sm:$0xff] }
  0x9e   :  { %2314 = vmatmul.msk.f32.gmra.mxu0 %vm91_vm5, %v2727_v36  ;;  %493 = vmatpush.msrb.mxu3 %v3049_v34 }
  0x9f   :  { %v471_v16 = vpop.f32.mrf.mxu3  ;;  %494 = vmatmul.f32.vlgmr.msrb.gmra.mxu3 %v2728_v55  ;;  %1183 = vmatpush.msrb.mxu0 %v3049_v34 }
  0xa0   :  { %693 = vmatpush.msra.mxu3 %v2885_v47 }
  0xa1   :  { %1640 = vmatpush.msra.mxu0 %v3017_v31 }
  0xa2   :  { %694 = vmatpush.msra.mxu3 %v2890_v48 }
  0xa3   :  { %1641 = vmatpush.msra.mxu0 %v3027_v32 }
  0xa4   :  { %695 = vmatpush.msra.mxu3 %v2899_v50 }
  0xa5   :  { %1642 = vmatpush.msra.mxu0 %v3038_v33 }
  0xa6   :  { %2315 = vmatmul.msk.f32.gmra.mxu0 %vm92_vm6, %v2727_v36  ;;  %696 = vmatpush.msra.mxu3 %v2911_v53 }
  0xa7   :  { %v474_v18 = vpop.f32.mrf.mxu3  ;;  %496 = vmatmul.f32.gmra.mxu3 %v2728_v55  ;;  %1643 = vmatpush.msra.mxu0 %v3049_v34 }
  0xa8   :  { %720 = vmatpush.msrb.mxu3 %v3017_v31 }
  0xaa   :  { %721 = vmatpush.msrb.mxu3 %v3027_v32 }
  0xac   :  { %722 = vmatpush.msrb.mxu3 %v3038_v33 }
  0xae   :  { %2316 = vmatmul.msk.f32.gmra.mxu0 %vm93_vm7, %v2727_v36  ;;  %723 = vmatpush.msrb.mxu3 %v3049_v34 }
  0xaf   :  { %v476_v21 = vpop.f32.mrf.mxu3  ;;  %498 = vmatmul.f32.gmra.mxu3 %v2728_v55 }
  0xb6   :  { %2317 = vmatmul.msk.f32.gmra.mxu0 %vm94_vm8, %v2727_v36 }
  0xb7   :  { %501 = vmatmul.f32.gmra.mxu3 %v2728_v55 }
  0xbe   :  { %2318 = vmatmul.msk.f32.gmra.mxu0 %vm95_vm9, %v2727_v36 }
  0xc6   :  { %2319 = vmatmul.msk.f32.gmra.mxu0 %vm96_vm10, %v2727_v36 }
  0xce   :  { %2320 = vmatmul.msk.f32.gmra.mxu0 %vm97_vm11, %v2727_v36 }
  0xd6   :  { %2321 = vmatmul.msk.f32.gmra.mxu0 %vm98_vm12, %v2727_v36 }
  0xde   :  { %2322 = vmatmul.msk.f32.gmra.mxu0 %vm99_vm13, %v2727_v36 }
  0xe6   :  { %2323 = vmatmul.msk.f32.gmra.mxu0 %vm100_vm14, %v2727_v36 }
  0xee   :  { %2324 = vmatmul.msk.f32.gmra.mxu0 %vm101_vm15, %v2727_v36 }
  0xf3   :  { %v167_v61 = vpop.f32.mrf.mxu0 }
  0xf4   :  { %2325 = vmatmul.msk.f32.vlgmr.msra.gmra.mxu1 %vm229_vm0, %v167_v61 }
  0xf5   :  { %2449 = vmatpush.msra.mxu1 %v3017_v31 }
  0xf7   :  { %2450 = vmatpush.msra.mxu1 %v3027_v32 }
  0xf9   :  { %2451 = vmatpush.msra.mxu1 %v3038_v33 }
  0xfb   :  { %v170_v62 = vpop.f32.mrf.mxu0  ;;  %2452 = vmatpush.msra.mxu1 %v3049_v34 }
  0xfc   :  { %2326 = vmatmul.msk.f32.gmra.mxu1 %vm229_vm0, %v170_v62 }
 0x103   :  { %v173_v63 = vpop.f32.mrf.mxu0 }
 0x104   :  { %2327 = vmatmul.msk.f32.gmra.mxu1 %vm229_vm0, %v173_v63 }
 0x10b   :  { %v176_v0 = vpop.f32.mrf.mxu0 }
 0x10c   :  { %2328 = vmatmul.msk.f32.gmra.mxu1 %vm229_vm0, %v176_v0 }
 0x113   :  { %v179_v1 = vpop.f32.mrf.mxu0 }
 0x114   :  { %2329 = vmatmul.msk.f32.gmra.mxu1 %vm229_vm0, %v179_v1 }
 0x11b   :  { %v182_v2 = vpop.f32.mrf.mxu0 }
 0x11c   :  { %2330 = vmatmul.msk.f32.gmra.mxu1 %vm229_vm0, %v182_v2 }
 0x123   :  { %v2942_v3 = vpop.f32.mrf.mxu0 }
 0x124   :  { %2331 = vmatmul.msk.f32.gmra.mxu1 %vm229_vm0, %v2942_v3 }
 0x12b   :  { %v2946_v4 = vpop.f32.mrf.mxu0 }
 0x12c   :  { %2332 = vmatmul.msk.f32.gmra.mxu1 %vm229_vm0, %v2946_v4 }
 0x133   :  { %v2950_v5 = vpop.f32.mrf.mxu0 }
 0x134   :  { %2333 = vmatmul.msk.f32.gmra.mxu1 %vm229_vm0, %v2950_v5 }
 0x13b   :  { %v2954_v6 = vpop.f32.mrf.mxu0 }
 0x13c   :  { %2334 = vmatmul.msk.f32.gmra.mxu1 %vm229_vm0, %v2954_v6 }
 0x143   :  { %v2958_v7 = vpop.f32.mrf.mxu0 }
 0x144   :  { %2335 = vmatmul.msk.f32.gmra.mxu1 %vm229_vm0, %v2958_v7 }
 0x14b   :  { %v2962_v8 = vpop.f32.mrf.mxu0 }
 0x14c   :  { %2336 = vmatmul.msk.f32.gmra.mxu1 %vm229_vm0, %v2962_v8 }
 0x153   :  { %v2978_v13 = vpop.f32.mrf.mxu0 }
 0x154   :  { %2337 = vmatmul.msk.f32.gmra.mxu1 %vm229_vm0, %v2978_v13 }
 0x15b   :  { %v2982_v15 = vpop.f32.mrf.mxu0 }
 0x15c   :  { %2338 = vmatmul.msk.f32.gmra.mxu1 %vm229_vm0, %v2982_v15 }
 0x163   :  { %v2986_v17 = vpop.f32.mrf.mxu0 }
 0x164   :  { %2339 = vmatmul.msk.f32.gmra.mxu1 %vm229_vm0, %v2986_v17 }
 0x16b   :  { %v2990_v19 = vpop.f32.mrf.mxu0 }
 0x16c   :  { %2340 = vmatmul.msk.f32.vlgmr.msra.gmra.mxu2 %vm229_vm0, %v2990_v19 }
 0x16d   :  { %950 = vmatpush.msra.mxu2 %v3017_v31 }
 0x16f   :  { %951 = vmatpush.msra.mxu2 %v3027_v32 }
 0x171   :  { %v295_v23 = vpop.f32.mrf.mxu1  ;;  %952 = vmatpush.msra.mxu2 %v3038_v33 }
 0x172   :  { %v296_v24 = vadd.f32 %v295_v23, %v3000_v22 }
 0x173   :  { %953 = vmatpush.msra.mxu2 %v3049_v34 }
 0x174   :  { %v507_v25 = vadd.f32 %v468_v14, %v296_v24  ;;  %2341 = vmatmul.msk.f32.vlgmr.msrb.gmra.mxu2 %vm229_vm0, %v167_v61 }
 0x175   :  { %1410 = vmatpush.msrb.mxu2 %v3017_v31 }
 0x176   :  { %2462 = vtanh.f32 %v507_v25  ;;  %v2357_v35 = vmul.f32 -1.442695, %v507_v25 }
 0x177   :  { %1411 = vmatpush.msrb.mxu2 %v3027_v32 }
 0x179   :  { %v298_v26 = vpop.f32.mrf.mxu1  ;;  %1412 = vmatpush.msrb.mxu2 %v3038_v33 }
 0x17a   :  { %v299_v27 = vadd.f32 %v298_v26, %v3000_v22 }
 0x17b   :  { %1413 = vmatpush.msrb.mxu2 %v3049_v34 }
 0x17c   :  { %v2463_v28 = vpop.eup %2462  ;;  %v3005_v29 = vadd.f32 %v471_v16, %v299_v27  ;;  %2342 = vmatmul.msk.f32.gmra.mxu2 %vm229_vm0, %v170_v62 }
 0x17d   :  { %601 = vrot.lane.b32.xlu1 %v2463_v28, %s2729_s4 }
 0x17e   :  { %2464 = vtanh.f32 %v3005_v29 }
 0x17f   :  { %2466 = vpow2.f32 %v2357_v35 }
 0x184   :  { %v2465_v30 = vpop.eup %2464  ;;  %2343 = vmatmul.msk.f32.gmra.mxu2 %vm229_vm0, %v173_v63  ;;  %v495_v63 = vpop.f32.mrf.mxu3 }
 0x185   :  { %603 = vrot.lane.b32.xlu2 %v2465_v30, %s2729_s4  ;;  %v2467_v36 = vpop.eup %2466 }
 0x186   :  { %v525_v37 = vadd.f32 1.0, %v2467_v36 }
 0x188   :  { %2468 = vrcp.f32 %v525_v37  ;;  %v540_v43 = vand.u32 2147483648, %v525_v37  ;;  %vm534_vm2 = vweird.f32 %v525_v37  ;;  %v538_v44 = vand.u32 2147483647, %v525_v37 }
 0x18a   :  { %v541_v46 = vor.u32 1.1754944e-38, %v540_v43  ;;  %vm539_vm4 = vcmp.eq.f32.partialorder %v538_v44, 8.507059e+37 }
 0x18c   :  { %2344 = vmatmul.msk.f32.gmra.mxu2 %vm229_vm0, %v176_v0 }
 0x18e   :  { %v2469_v38 = vpop.eup %2468 }
 0x18f   :  { %v530_v39 = vmul.f32 %v2469_v38, %v525_v37  ;;  %vm535_vm1 = vweird.f32 %v2469_v38 }
 0x190   :  { %vm536_vm3 = vmor %vm534_vm2, %vm535_vm1 }
 0x191   :  { %v531_v40 = vsub.f32 1.0, %v530_v39 }
 0x193   :  { %v532_v41 = vmul.f32 %v2469_v38, %v531_v40 }
 0x194   :  { %2345 = vmatmul.msk.f32.gmra.mxu2 %vm229_vm0, %v179_v1  ;;  %v497_v1 = vpop.f32.mrf.mxu3 }
 0x195   :  { %v533_v42 = vadd.f32 %v2469_v38, %v532_v41 }
 0x197   :  { %v537_v45 = vsel %vm536_vm3, %v2469_v38, %v533_v42 }
 0x198   :  { %v3091_v51 = vsel %vm539_vm4, %v541_v46, %v537_v45 }
 0x199   :  { %v593_v36 = vmul.f32 0.0, %v3091_v51 }
 0x19c   :  { %2346 = vmatmul.msk.f32.gmra.mxu2 %vm229_vm0, %v182_v2  ;;  %v499_v12 = vpop.f32.mrf.mxu3 }
 0x1a4   :  { %2347 = vmatmul.msk.f32.gmra.mxu2 %vm229_vm0, %v2942_v3  ;;  %v502_v23 = vpop.f32.mrf.mxu3 }
 0x1ac   :  { %2348 = vmatmul.msk.f32.gmra.mxu2 %vm229_vm0, %v2946_v4  ;;  %v2358_v4 = vmul.f32 -1.442695, %v3005_v29 }
 0x1ae   :  { %2470 = vpow2.f32 %v2358_v4 }
 0x1b4   :  { %2349 = vmatmul.msk.f32.gmra.mxu2 %vm229_vm0, %v2950_v5 }
 0x1bc   :  { %2350 = vmatmul.msk.f32.gmra.mxu2 %vm229_vm0, %v2954_v6  ;;  %v2471_v6 = vpop.eup %2470 }
 0x1c4   :  { %2351 = vmatmul.msk.f32.gmra.mxu2 %vm229_vm0, %v2958_v7 }
 0x1cc   :  { %2352 = vmatmul.msk.f32.gmra.mxu2 %vm229_vm0, %v2962_v8  ;;  %v526_v8 = vadd.f32 1.0, %v2471_v6 }
 0x1ce   :  { %2472 = vrcp.f32 %v526_v8  ;;  %v555_v27 = vand.u32 2147483648, %v526_v8  ;;  %vm549_vm6 = vweird.f32 %v526_v8 }
 0x1d0   :  { %v556_v35 = vor.u32 1.1754944e-38, %v555_v27 }
 0x1d4   :  { %2353 = vmatmul.msk.f32.gmra.mxu2 %vm229_vm0, %v2978_v13  ;;  %v2473_v10 = vpop.eup %2472  ;;  %v3127_v13 = vperm.slane %v2995_v20, 1  ;;  %v553_v20 = vand.u32 2147483647, %v526_v8 }
 0x1d5   :  { %v545_v11 = vmul.f32 %v2473_v10, %v526_v8  ;;  %vm550_vm5 = vweird.f32 %v2473_v10 }
 0x1d6   :  { %vm551_vm7 = vmor %vm549_vm6, %vm550_vm5  ;;  %vm554_vm8 = vcmp.eq.f32.partialorder %v553_v20, 8.507059e+37 }
 0x1d7   :  { %v546_v16 = vsub.f32 1.0, %v545_v11 }
 0x1dc   :  { %2354 = vmatmul.msk.f32.gmra.mxu2 %vm229_vm0, %v2982_v15 }
 0x1df   :  { %v604_v18 = vpop.permute.xlu2 %603 }
 0x1e4   :  { %2355 = vmatmul.msk.f32.gmra.mxu2 %vm229_vm0, %v2986_v17 }
 0x1ec   :  { %2356 = vmatmul.msk.f32.gmra.mxu2 %vm229_vm0, %v2990_v19  ;;  %v547_v19 = vmul.f32 %v2473_v10, %v546_v16 }
 0x1ee   :  { %v548_v25 = vadd.f32 %v2473_v10, %v547_v19 }
 0x1ef   :  { %v602_v49 = vpop.permute.xlu1 %601  ;;  %v3093_v52 = vpop.f32.mrf.mxu2 }
 0x1f0   :  { %v613_v54 = vmul.f32 %v602_v49, %v3091_v51  ;;  %v552_v29 = vsel %vm551_vm7, %v2473_v10, %v548_v25 }
 0x1f1   :  { %v3133_v37 = vsel %vm554_vm8, %v556_v35, %v552_v29 }
 0x1f2   :  { %621 = vrot.lane.b32.xlu2 %v613_v54, %s2730_s11  ;;  %v614_v39 = vmul.f32 %v604_v18, %v3133_v37 }
 0x1f7   :  { %v3097_v55 = vpop.f32.mrf.mxu2 }
 0x1ff   :  { %v3099_v56 = vpop.f32.mrf.mxu2 }
 0x207   :  { %v3101_v57 = vpop.f32.mrf.mxu2 }
 0x20f   :  { %v3103_v58 = vpop.f32.mrf.mxu2 }
 0x217   :  { %v3105_v59 = vpop.f32.mrf.mxu2 }
 0x21f   :  { %v3107_v60 = vpop.f32.mrf.mxu2 }
 0x227   :  { %v3109_v61 = vpop.f32.mrf.mxu2 }
 0x22f   :  { %v3111_v62 = vpop.f32.mrf.mxu2 }
 0x237   :  { %v3113_v0 = vpop.f32.mrf.mxu2 }
 0x23f   :  { %v3115_v2 = vpop.f32.mrf.mxu2 }
 0x247   :  { %v3117_v3 = vpop.f32.mrf.mxu2 }
 0x24c   :  { %v622_v30 = vpop.permute.xlu2 %621 }
 0x24d   :  { %v3135_v38 = vadd.f32 %v622_v30, %v593_v36 }
 0x24f   :  { %v3120_v5 = vpop.f32.mrf.mxu2 }
 0x257   :  { %v3122_v7 = vpop.f32.mrf.mxu2 }
 0x25f   :  { %v3124_v9 = vpop.f32.mrf.mxu2 }
 0x267   :  { %v402_v14 = vpop.f32.mrf.mxu2 }
 0x268   :  { %v403_v15 = vadd.f32 %v402_v14, %v3127_v13 }
 0x26a   :  { %v511_v17 = vadd.f32 %v499_v12, %v403_v15 }
 0x26c   :  { %2474 = vtanh.f32 %v511_v17  ;;  %v2359_v42 = vmul.f32 -1.442695, %v511_v17 }
 0x26f   :  { %v405_v21 = vpop.f32.mrf.mxu2 }
 0x270   :  { %v406_v24 = vadd.f32 %v405_v21, %v3127_v13 }
 0x272   :  { %v2475_v26 = vpop.eup %2474  ;;  %v512_v28 = vadd.f32 %v502_v23, %v406_v24 }
 0x273   :  { %605 = vrot.lane.b32.xlu0 %v2475_v26, %s2729_s4 }
 0x274   :  { %2476 = vtanh.f32 %v512_v28  ;;  %v2360_v43 = vmul.f32 -1.442695, %v512_v28  ;;  %v594_v28 = vmul.f32 0.0, %v3133_v37 }
 0x275   :  { %2478 = vtanh.f32 %v3135_v38 }
 0x276   :  { %2480 = vpow2.f32 %v2359_v42 }
 0x277   :  { %2482 = vpow2.f32 %v2360_v43 }
 0x27a   :  { %v2477_v40 = vpop.eup %2476 }
 0x27b   :  { %607 = vrot.lane.b32.xlu1 %v2477_v40, %s2729_s4  ;;  %623 = vrot.lane.b32.xlu0 %v614_v39, %s2730_s11  ;;  %v2479_v41 = vpop.eup %2478 }
 0x27c   :  { %v2481_v44 = vpop.eup %2480 }
 0x27d   :  { %v527_v45 = vadd.f32 1.0, %v2481_v44  ;;  %v2483_v46 = vpop.eup %2482 }
 0x27e   :  { %v528_v49 = vadd.f32 1.0, %v2483_v46 }
 0x27f   :  { %2484 = vrcp.f32 %v527_v45  ;;  %v570_v12 = vand.u32 2147483648, %v527_v45  ;;  %vm564_vm10 = vweird.f32 %v527_v45  ;;  %v568_v14 = vand.u32 2147483647, %v527_v45 }
 0x280   :  { %2486 = vrcp.f32 %v528_v49  ;;  %v585_v24 = vand.u32 2147483648, %v528_v49  ;;  %vm579_vm14 = vweird.f32 %v528_v49  ;;  %v583_v25 = vand.u32 2147483647, %v528_v49 }
 0x281   :  { %v571_v17 = vor.u32 1.1754944e-38, %v570_v12  ;;  %vm569_vm12 = vcmp.eq.f32.partialorder %v568_v14, 8.507059e+37  ;;  %v301_v12 = vpop.f32.mrf.mxu1 }
 0x282   :  { %v586_v27 = vor.u32 1.1754944e-38, %v585_v24  ;;  %vm584_vm1 = vcmp.eq.f32.partialorder %v583_v25, 8.507059e+37  ;;  %v302_v14 = vadd.f32 %v301_v12, %v3000_v22 }
 0x283   :  { %645 = vrot.lane.b32.xlu0 %v2479_v41, %s2729_s4 }
 0x285   :  { %v2485_v54 = vpop.eup %2484 }
 0x286   :  { %v560_v63 = vmul.f32 %v2485_v54, %v527_v45  ;;  %v2487_v4 = vpop.eup %2486  ;;  %vm565_vm9 = vweird.f32 %v2485_v54 }
 0x287   :  { %v575_v8 = vmul.f32 %v2487_v4, %v528_v49  ;;  %vm566_vm11 = vmor %vm564_vm10, %vm565_vm9  ;;  %vm580_vm13 = vweird.f32 %v2487_v4 }
 0x288   :  { %v561_v1 = vsub.f32 1.0, %v560_v63  ;;  %vm581_vm15 = vmor %vm579_vm14, %vm580_vm13 }
 0x289   :  { %v576_v11 = vsub.f32 1.0, %v575_v8 }
 0x28a   :  { %v562_v6 = vmul.f32 %v2485_v54, %v561_v1 }
 0x28b   :  { %v577_v16 = vmul.f32 %v2487_v4, %v576_v11 }
 0x28c   :  { %v563_v10 = vadd.f32 %v2485_v54, %v562_v6 }
 0x28d   :  { %v578_v23 = vadd.f32 %v2487_v4, %v577_v16 }
 0x28e   :  { %v567_v15 = vsel %vm566_vm11, %v2485_v54, %v563_v10 }
 0x28f   :  { %v572_v19 = vsel %vm569_vm12, %v571_v17, %v567_v15  ;;  %v582_v26 = vsel %vm581_vm15, %v2487_v4, %v578_v23 }
 0x290   :  { %v587_v29 = vsel %vm584_vm1, %v586_v27, %v582_v26  ;;  %v595_v46 = vmul.f32 0.0, %v572_v19  ;;  %v304_v26 = vpop.f32.mrf.mxu1 }
 0x291   :  { %v596_v42 = vmul.f32 0.0, %v587_v29 }
 0x2e5   :  { %v606_v18 = vpop.permute.xlu0 %605 }
 0x2e6   :  { %v615_v21 = vmul.f32 %v606_v18, %v572_v19 }
 0x2e8   :  { %625 = vrot.lane.b32.xlu1 %v615_v21, %s2730_s11 }
 0x2ed   :  { %v608_v20 = vpop.permute.xlu1 %607  ;;  %v624_v30 = vpop.permute.xlu0 %623 }
 0x2ee   :  { %v616_v35 = vmul.f32 %v608_v20, %v587_v29  ;;  %v3144_v36 = vadd.f32 %v624_v30, %v594_v28  ;;  %v305_v28 = vadd.f32 %v304_v26, %v3000_v22 }
 0x2f0   :  { %2488 = vtanh.f32 %v3144_v36  ;;  %627 = vrot.lane.b32.xlu2 %v616_v35, %s2730_s11 }
 0x2f5   :  { %v646_v40 = vpop.permute.xlu0 %645 }
 0x2f6   :  { %v2489_v39 = vpop.eup %2488  ;;  %v657_v41 = vmul.f32 %v646_v40, %v3091_v51 }
 0x2f7   :  { %647 = vrot.lane.b32.xlu1 %v2489_v39, %s2729_s4 }
 0x2ff   :  { %665 = vrot.lane.b32.xlu1 %v657_v41, %s2730_s11 }
 0x34a   :  { %v628_v43 = vpop.permute.xlu2 %627 }
 0x34b   :  { %v3151_v44 = vadd.f32 %v628_v43, %v596_v42 }
 0x34d   :  { %2490 = vtanh.f32 %v3151_v44 }
 0x353   :  { %v2491_v45 = vpop.eup %2490 }
 0x354   :  { %651 = vrot.lane.b32.xlu0 %v2491_v45, %s2729_s4 }
 0x35a   :  { %v626_v49 = vpop.permute.xlu1 %625 }
 0x35b   :  { %v3155_v54 = vadd.f32 %v626_v49, %v595_v46 }
 0x35d   :  { %2492 = vtanh.f32 %v3155_v54 }
 0x363   :  { %v2493_v63 = vpop.eup %2492 }
 0x364   :  { %649 = vrot.lane.b32.xlu2 %v2493_v63, %s2729_s4 }
 0x369   :  { %v648_v51 = vpop.permute.xlu1 %647 }
 0x36a   :  { %v658_v1 = vmul.f32 %v648_v51, %v3133_v37 }
 0x36c   :  { %667 = vrot.lane.b32.xlu2 %v658_v1, %s2730_s11 }
 0x371   :  { %v666_v4 = vpop.permute.xlu1 %665 }
 0x372   :  { %2361 = vmatmul.msk.f32.vlgmr.msra.gmra.mxu3 %vm229_vm0, %v666_v4 }
 0x373   :  { %1153 = vmatpush.msra.mxu3 %v2885_v47 }
 0x375   :  { %1154 = vmatpush.msra.mxu3 %v2890_v48 }
 0x377   :  { %1155 = vmatpush.msra.mxu3 %v2899_v50 }
 0x379   :  { %1156 = vmatpush.msra.mxu3 %v2911_v53 }
 0x3be   :  { %v650_v6 = vpop.permute.xlu2 %649 }
 0x3bf   :  { %v659_v8 = vmul.f32 %v650_v6, %v572_v19 }
 0x3c1   :  { %669 = vrot.lane.b32.xlu0 %v659_v8, %s2730_s11 }
 0x3c6   :  { %v652_v10 = vpop.permute.xlu0 %651  ;;  %v668_v11 = vpop.permute.xlu2 %667 }
 0x3c7   :  { %v660_v37 = vmul.f32 %v652_v10, %v587_v29  ;;  %2362 = vmatmul.msk.f32.gmra.mxu3 %vm229_vm0, %v668_v11 }
 0x3c9   :  { %671 = vrot.lane.b32.xlu1 %v660_v37, %s2730_s11 }
 0x3f5   :  { %v698_v15 = vpop.f32.mrf.mxu3 }
 0x3f6   :  { %v737_v16 = vadd.f32 %v698_v15, %v302_v14 }
 0x3f8   :  { %2494 = vtanh.f32 %v737_v16  ;;  %v2369_v18 = vmul.f32 -1.442695, %v737_v16 }
 0x3fa   :  { %2496 = vpow2.f32 %v2369_v18 }
 0x3fe   :  { %v2495_v17 = vpop.eup %2494 }
 0x3ff   :  { %831 = vrot.lane.b32.xlu2 %v2495_v17, %s2729_s4 }
 0x400   :  { %v2497_v21 = vpop.eup %2496 }
 0x401   :  { %v755_v23 = vadd.f32 1.0, %v2497_v21 }
 0x403   :  { %2498 = vrcp.f32 %v755_v23  ;;  %v770_v41 = vand.u32 2147483648, %v755_v23  ;;  %vm764_vm3 = vweird.f32 %v755_v23  ;;  %v768_v42 = vand.u32 2147483647, %v755_v23 }
 0x405   :  { %v771_v45 = vor.u32 1.1754944e-38, %v770_v41  ;;  %vm769_vm5 = vcmp.eq.f32.partialorder %v768_v42, 8.507059e+37 }
 0x409   :  { %v2499_v25 = vpop.eup %2498 }
 0x40a   :  { %v760_v27 = vmul.f32 %v2499_v25, %v755_v23  ;;  %vm765_vm2 = vweird.f32 %v2499_v25 }
 0x40b   :  { %vm766_vm4 = vmor %vm764_vm3, %vm765_vm2 }
 0x40c   :  { %v761_v29 = vsub.f32 1.0, %v760_v27 }
 0x40e   :  { %v762_v35 = vmul.f32 %v2499_v25, %v761_v29 }
 0x410   :  { %v763_v39 = vadd.f32 %v2499_v25, %v762_v35  ;;  %v400_v35 = vadd.f32 %v3124_v9, %v3127_v13 }
 0x412   :  { %v767_v43 = vsel %vm766_vm4, %v2499_v25, %v763_v39 }
 0x413   :  { %v3182_v46 = vsel %vm769_vm5, %v771_v45, %v767_v43 }
 0x433   :  { %v670_v19 = vpop.permute.xlu0 %669 }
 0x434   :  { %2363 = vmatmul.msk.f32.gmra.mxu3 %vm229_vm0, %v670_v19 }
 0x43b   :  { %v672_v24 = vpop.permute.xlu1 %671 }
 0x43c   :  { %2364 = vmatmul.msk.f32.gmra.mxu3 %vm229_vm0, %v672_v24 }
 0x444   :  { %2365 = vmatmul.msk.f32.vlgmr.msrb.gmra.mxu3 %vm229_vm0, %v666_v4 }
 0x445   :  { %1613 = vmatpush.msrb.mxu3 %v2885_v47 }
 0x447   :  { %1614 = vmatpush.msrb.mxu3 %v2890_v48 }
 0x449   :  { %1615 = vmatpush.msrb.mxu3 %v2899_v50 }
 0x44a   :  { %v701_v20 = vpop.f32.mrf.mxu3 }
 0x44b   :  { %v738_v30 = vadd.f32 %v701_v20, %v305_v28  ;;  %1616 = vmatpush.msrb.mxu3 %v2911_v53 }
 0x44c   :  { %2366 = vmatmul.msk.f32.gmra.mxu3 %vm229_vm0, %v668_v11 }
 0x44d   :  { %2500 = vtanh.f32 %v738_v30  ;;  %v2370_v51 = vmul.f32 -1.442695, %v738_v30 }
 0x44f   :  { %2502 = vpow2.f32 %v2370_v51 }
 0x453   :  { %v2501_v40 = vpop.eup %2500 }
 0x454   :  { %2367 = vmatmul.msk.f32.gmra.mxu3 %vm229_vm0, %v670_v19  ;;  %833 = vrot.lane.b32.xlu0 %v2501_v40, %s2729_s4  ;;  %v823_v19 = vmul.f32 %v3182_v46, %v3135_v38  ;;  %v397_v38 = vadd.f32 %v3122_v7, %v3127_v13 }
 0x455   :  { %v2503_v1 = vpop.eup %2502 }
 0x456   :  { %v756_v4 = vadd.f32 1.0, %v2503_v1 }
 0x458   :  { %2504 = vrcp.f32 %v756_v4  ;;  %v785_v15 = vand.u32 2147483648, %v756_v4  ;;  %vm779_vm7 = vweird.f32 %v756_v4  ;;  %v783_v16 = vand.u32 2147483647, %v756_v4 }
 0x459   :  { %v832_v49 = vpop.permute.xlu2 %831 }
 0x45a   :  { %v843_v63 = vmul.f32 %v832_v49, %v3182_v46  ;;  %v786_v21 = vor.u32 1.1754944e-38, %v785_v15  ;;  %vm784_vm9 = vcmp.eq.f32.partialorder %v783_v16, 8.507059e+37 }
 0x45c   :  { %2368 = vmatmul.msk.f32.gmra.mxu3 %vm229_vm0, %v672_v24  ;;  %851 = vrot.lane.b32.xlu2 %v843_v63, %s2730_s11 }
 0x45e   :  { %v2505_v6 = vpop.eup %2504 }
 0x45f   :  { %v775_v8 = vmul.f32 %v2505_v6, %v756_v4  ;;  %vm780_vm6 = vweird.f32 %v2505_v6 }
 0x460   :  { %vm781_vm8 = vmor %vm779_vm7, %vm780_vm6 }
 0x461   :  { %v776_v11 = vsub.f32 1.0, %v775_v8 }
 0x463   :  { %v777_v37 = vmul.f32 %v2505_v6, %v776_v11 }
 0x465   :  { %v778_v14 = vadd.f32 %v2505_v6, %v777_v37 }
 0x467   :  { %v782_v18 = vsel %vm781_vm8, %v2505_v6, %v778_v14 }
 0x468   :  { %v3191_v25 = vsel %vm784_vm9, %v786_v21, %v782_v18 }
 0x469   :  { %v824_v9 = vmul.f32 %v3191_v25, %v3144_v36 }
 0x4b6   :  { %v852_v17 = vpop.permute.xlu2 %851 }
 0x4b7   :  { %v704_v10 = vpop.f32.mrf.mxu3  ;;  %v3189_v23 = vadd.f32 %v852_v17, %v823_v19 }
 0x4b9   :  { %2506 = vtanh.f32 %v3189_v23 }
 0x4bf   :  { %v706_v12 = vpop.f32.mrf.mxu3  ;;  %v2507_v20 = vpop.eup %2506 }
 0x4c6   :  { %v834_v24 = vpop.permute.xlu0 %833 }
 0x4c7   :  { %v844_v26 = vmul.f32 %v834_v24, %v3191_v25  ;;  %v725_v27 = vpop.f32.mrf.mxu3 }
 0x4c9   :  { %853 = vrot.lane.b32.xlu0 %v844_v26, %s2730_s11 }
 0x4cf   :  { %v727_v28 = vpop.f32.mrf.mxu3 }
 0x4d1   :  { %875 = vrot.lane.b32.xlu0 %v2507_v20, %s2729_s4 }
 0x4d7   :  { %v729_v29 = vpop.f32.mrf.mxu3 }
 0x4d8   :  { %v741_v30 = vadd.f32 %v729_v29, %v397_v38 }
 0x4da   :  { %2508 = vtanh.f32 %v741_v30  ;;  %v2371_v43 = vmul.f32 -1.442695, %v741_v30 }
 0x4df   :  { %v732_v39 = vpop.f32.mrf.mxu3 }
 0x4e0   :  { %v2509_v40 = vpop.eup %2508  ;;  %v742_v41 = vadd.f32 %v732_v39, %v400_v35 }
 0x4e1   :  { %835 = vrot.lane.b32.xlu1 %v2509_v40, %s2729_s4 }
 0x4e2   :  { %2510 = vtanh.f32 %v742_v41  ;;  %v2372_v45 = vmul.f32 -1.442695, %v742_v41 }
 0x4e3   :  { %2512 = vpow2.f32 %v2371_v43 }
 0x4e4   :  { %2514 = vpow2.f32 %v2372_v45 }
 0x4e8   :  { %v2511_v42 = vpop.eup %2510 }
 0x4e9   :  { %837 = vrot.lane.b32.xlu1 %v2511_v42, %s2729_s4  ;;  %v2513_v49 = vpop.eup %2512 }
 0x4ea   :  { %v757_v7 = vadd.f32 1.0, %v2513_v49  ;;  %v2515_v63 = vpop.eup %2514 }
 0x4eb   :  { %v758_v51 = vadd.f32 1.0, %v2515_v63 }
 0x4ec   :  { %2516 = vrcp.f32 %v757_v7  ;;  %v800_v18 = vand.u32 2147483648, %v757_v7  ;;  %vm794_vm11 = vweird.f32 %v757_v7  ;;  %v798_v19 = vand.u32 2147483647, %v757_v7 }
 0x4ed   :  { %v815_v29 = vand.u32 2147483648, %v758_v51  ;;  %vm809_vm15 = vweird.f32 %v758_v51 }
 0x4ee   :  { %v801_v26 = vor.u32 1.1754944e-38, %v800_v18  ;;  %vm799_vm13 = vcmp.eq.f32.partialorder %v798_v19, 8.507059e+37 }
 0x4ef   :  { %v816_v35 = vor.u32 1.1754944e-38, %v815_v29 }
 0x4f2   :  { %v2517_v6 = vpop.eup %2516 }
 0x4f3   :  { %v790_v8 = vmul.f32 %v2517_v6, %v757_v7  ;;  %vm795_vm10 = vweird.f32 %v2517_v6 }
 0x4f4   :  { %vm796_vm12 = vmor %vm794_vm11, %vm795_vm10 }
 0x4f5   :  { %v791_v11 = vsub.f32 1.0, %v790_v8 }
 0x4f7   :  { %v792_v14 = vmul.f32 %v2517_v6, %v791_v11 }
 0x4f9   :  { %v793_v36 = vadd.f32 %v2517_v6, %v792_v14 }
 0x4fb   :  { %v797_v21 = vsel %vm796_vm12, %v2517_v6, %v793_v36 }
 0x4fc   :  { %v802_v28 = vsel %vm799_vm13, %v801_v26, %v797_v21 }
 0x4fd   :  { %v825_v42 = vmul.f32 %v802_v28, %v3155_v54 }
 0x53b   :  { %v854_v1 = vpop.permute.xlu0 %853 }
 0x53c   :  { %v3205_v4 = vadd.f32 %v854_v1, %v824_v9 }
 0x53e   :  { %2518 = vtanh.f32 %v3205_v4 }
 0x53f   :  { %2520 = vrcp.f32 %v758_v51 }
 0x543   :  { %v876_v12 = vpop.permute.xlu0 %875 }
 0x544   :  { %v2519_v10 = vpop.eup %2518  ;;  %v887_v16 = vmul.f32 %v876_v12, %v3182_v46  ;;  %v813_v46 = vand.u32 2147483647, %v758_v51 }
 0x545   :  { %v2521_v37 = vpop.eup %2520  ;;  %877 = vrot.lane.b32.xlu1 %v2519_v10, %s2729_s4 }
 0x546   :  { %v805_v15 = vmul.f32 %v2521_v37, %v758_v51  ;;  %vm810_vm14 = vweird.f32 %v2521_v37  ;;  %vm814_vm2 = vcmp.eq.f32.partialorder %v813_v46, 8.507059e+37 }
 0x547   :  { %vm811_vm1 = vmor %vm809_vm15, %vm810_vm14 }
 0x548   :  { %v806_v17 = vsub.f32 1.0, %v805_v15 }
 0x54a   :  { %v807_v24 = vmul.f32 %v2521_v37, %v806_v17 }
 0x54c   :  { %v808_v38 = vadd.f32 %v2521_v37, %v807_v24 }
 0x54d   :  { %895 = vrot.lane.b32.xlu1 %v887_v16, %s2730_s11 }
 0x54e   :  { %v812_v30 = vsel %vm811_vm1, %v2521_v37, %v808_v38 }
 0x54f   :  { %v817_v39 = vsel %vm814_vm2, %v816_v35, %v812_v30 }
 0x550   :  { %v826_v7 = vmul.f32 %v817_v39, %v3151_v44  ;;  %v307_v44 = vpop.f32.mrf.mxu1 }
 0x551   :  { %v308_v15 = vadd.f32 %v307_v44, %v3000_v22 }
 0x553   :  { %v836_v27 = vpop.permute.xlu1 %835 }
 0x554   :  { %v845_v20 = vmul.f32 %v836_v27, %v802_v28 }
 0x556   :  { %855 = vrot.lane.b32.xlu2 %v845_v20, %s2730_s11 }
 0x55b   :  { %v838_v40 = vpop.permute.xlu1 %837 }
 0x55c   :  { %v846_v41 = vmul.f32 %v838_v40, %v817_v39 }
 0x55e   :  { %857 = vrot.lane.b32.xlu2 %v846_v41, %s2730_s11 }
 0x5b0   :  { %v856_v43 = vpop.permute.xlu2 %855 }
 0x5b1   :  { %v3214_v45 = vadd.f32 %v856_v43, %v825_v42 }
 0x5b3   :  { %2522 = vtanh.f32 %v3214_v45 }
 0x5b7   :  { %v878_v49 = vpop.permute.xlu1 %877 }
 0x5b8   :  { %v888_v63 = vmul.f32 %v878_v49, %v3191_v25  ;;  %v858_v9 = vpop.permute.xlu2 %857  ;;  %v310_v25 = vpop.f32.mrf.mxu1 }
 0x5b9   :  { %v2523_v51 = vpop.eup %2522  ;;  %v3219_v1 = vadd.f32 %v858_v9, %v826_v7  ;;  %v311_v21 = vadd.f32 %v310_v25, %v3000_v22 }
 0x5ba   :  { %897 = vrot.lane.b32.xlu2 %v888_v63, %s2730_s11  ;;  %879 = vrot.lane.b32.xlu0 %v2523_v51, %s2729_s4 }
 0x5bb   :  { %2524 = vtanh.f32 %v3219_v1 }
 0x5bf   :  { %v896_v54 = vpop.permute.xlu1 %895 }
 0x5c0   :  { %2373 = vmatmul.msk.f32.vlgmr.msrb.gmra.mxu1 %vm229_vm0, %v896_v54  ;;  %2377 = vmatmul.msk.f32.vlgmr.msra.gmra.mxu2 %vm229_vm0, %v896_v54  ;;  %v3235_v8 = vpop.f32.mrf.mxu1 }
 0x5c1   :  { %v2525_v6 = vpop.eup %2524  ;;  %1383 = vmatpush.msrb.mxu1 %v2885_v47  ;;  %1870 = vmatpush.msra.mxu2 %v3017_v31 }
 0x5c2   :  { %881 = vrot.lane.b32.xlu0 %v2525_v6, %s2729_s4 }
 0x5c3   :  { %1384 = vmatpush.msrb.mxu1 %v2890_v48  ;;  %1871 = vmatpush.msra.mxu2 %v3027_v32 }
 0x5c5   :  { %1385 = vmatpush.msrb.mxu1 %v2899_v50  ;;  %1872 = vmatpush.msra.mxu2 %v3038_v33 }
 0x5c7   :  { %1386 = vmatpush.msrb.mxu1 %v2911_v53  ;;  %1873 = vmatpush.msra.mxu2 %v3049_v34 }
 0x5c8   :  { %v3237_v47 = vpop.f32.mrf.mxu1 }
 0x5d0   :  { %v3239_v31 = vpop.f32.mrf.mxu1 }
 0x5d8   :  { %v3241_v10 = vpop.f32.mrf.mxu1 }
 0x5e0   :  { %v3243_v48 = vpop.f32.mrf.mxu1 }
 0x5e8   :  { %v3247_v50 = vpop.f32.mrf.mxu1 }
 0x5f0   :  { %v3249_v53 = vpop.f32.mrf.mxu1 }
 0x5f8   :  { %v3251_v33 = vpop.f32.mrf.mxu1 }
 0x600   :  { %v3254_v12 = vpop.f32.mrf.mxu1 }
 0x614   :  { %v898_v32 = vpop.permute.xlu2 %897 }
 0x615   :  { %2374 = vmatmul.msk.f32.gmra.mxu1 %vm229_vm0, %v898_v32  ;;  %2378 = vmatmul.msk.f32.gmra.mxu2 %vm229_vm0, %v898_v32 }
 0x62c   :  { %v880_v34 = vpop.permute.xlu0 %879 }
 0x62d   :  { %v889_v11 = vmul.f32 %v880_v34, %v802_v28 }
 0x62f   :  { %899 = vrot.lane.b32.xlu1 %v889_v11, %s2730_s11 }
 0x634   :  { %v882_v37 = vpop.permute.xlu0 %881 }
 0x635   :  { %v890_v14 = vmul.f32 %v882_v37, %v817_v39 }
 0x637   :  { %901 = vrot.lane.b32.xlu2 %v890_v14, %s2730_s11 }
 0x63d   :  { %v928_v16 = vpop.f32.mrf.mxu1 }
 0x63e   :  { %v967_v36 = vadd.f32 %v928_v16, %v308_v15 }
 0x640   :  { %2526 = vtanh.f32 %v967_v36  ;;  %v2381_v19 = vmul.f32 -1.442695, %v967_v36 }
 0x642   :  { %2528 = vpow2.f32 %v2381_v19 }
 0x643   :  { %v955_v17 = vpop.f32.mrf.mxu2 }
 0x646   :  { %v2527_v18 = vpop.eup %2526 }
 0x647   :  { %1061 = vrot.lane.b32.xlu0 %v2527_v18, %s2729_s4 }
 0x648   :  { %v2529_v27 = vpop.eup %2528 }
 0x649   :  { %v985_v20 = vadd.f32 1.0, %v2529_v27 }
 0x64b   :  { %v1000_v42 = vand.u32 2147483648, %v985_v20  ;;  %vm994_vm4 = vweird.f32 %v985_v20  ;;  %v998_v43 = vand.u32 2147483647, %v985_v20 }
 0x64d   :  { %v1001_v7 = vor.u32 1.1754944e-38, %v1000_v42  ;;  %vm999_vm6 = vcmp.eq.f32.partialorder %v998_v43, 8.507059e+37 }
 0x691   :  { %v902_v35 = vpop.permute.xlu2 %901 }
 0x692   :  { %v931_v24 = vpop.f32.mrf.mxu1 }
 0x693   :  { %v968_v26 = vadd.f32 %v931_v24, %v311_v21  ;;  %v391_v24 = vadd.f32 %v3117_v3, %v3127_v13 }
 0x695   :  { %2530 = vtanh.f32 %v968_v26  ;;  %v2382_v54 = vmul.f32 -1.442695, %v968_v26 }
 0x696   :  { %2532 = vrcp.f32 %v985_v20 }
 0x697   :  { %2534 = vpow2.f32 %v2382_v54 }
 0x698   :  { %v957_v28 = vpop.f32.mrf.mxu2 }
 0x69b   :  { %v2531_v38 = vpop.eup %2530 }
 0x69c   :  { %1063 = vrot.lane.b32.xlu1 %v2531_v38, %s2729_s4  ;;  %v2533_v46 = vpop.eup %2532 }
 0x69d   :  { %v990_v30 = vmul.f32 %v2533_v46, %v985_v20  ;;  %vm995_vm3 = vweird.f32 %v2533_v46  ;;  %v2535_v6 = vpop.eup %2534  ;;  %v394_v20 = vadd.f32 %v3120_v5, %v3127_v13 }
 0x69e   :  { %vm996_vm5 = vmor %vm994_vm4, %vm995_vm3  ;;  %v986_v44 = vadd.f32 1.0, %v2535_v6 }
 0x69f   :  { %v991_v39 = vsub.f32 1.0, %v990_v30 }
 0x6a0   :  { %2536 = vrcp.f32 %v986_v44  ;;  %v1015_v14 = vand.u32 2147483648, %v986_v44  ;;  %vm1009_vm8 = vweird.f32 %v986_v44  ;;  %v1013_v15 = vand.u32 2147483647, %v986_v44 }
 0x6a1   :  { %v900_v29 = vpop.permute.xlu1 %899  ;;  %v992_v40 = vmul.f32 %v2533_v46, %v991_v39 }
 0x6a2   :  { %2375 = vmatmul.msk.f32.gmra.mxu1 %vm229_vm0, %v900_v29  ;;  %2379 = vmatmul.msk.f32.gmra.mxu2 %vm229_vm0, %v900_v29  ;;  %v1016_v36 = vor.u32 1.1754944e-38, %v1015_v14  ;;  %vm1014_vm10 = vcmp.eq.f32.partialorder %v1013_v15, 8.507059e+37 }
 0x6a3   :  { %v993_v41 = vadd.f32 %v2533_v46, %v992_v40 }
 0x6a5   :  { %v997_v49 = vsel %vm996_vm5, %v2533_v46, %v993_v41 }
 0x6a6   :  { %v3265_v63 = vsel %vm999_vm6, %v1001_v7, %v997_v49  ;;  %v2537_v25 = vpop.eup %2536 }
 0x6a7   :  { %v1005_v32 = vmul.f32 %v2537_v25, %v986_v44  ;;  %vm1010_vm7 = vweird.f32 %v2537_v25  ;;  %v1053_v29 = vmul.f32 %v3265_v63, %v3189_v23 }
 0x6a8   :  { %vm1011_vm9 = vmor %vm1009_vm8, %vm1010_vm7 }
 0x6a9   :  { %v1006_v34 = vsub.f32 1.0, %v1005_v32 }
 0x6aa   :  { %2376 = vmatmul.msk.f32.gmra.mxu1 %vm229_vm0, %v902_v35  ;;  %2380 = vmatmul.msk.f32.gmra.mxu2 %vm229_vm0, %v902_v35 }
 0x6ab   :  { %v1007_v11 = vmul.f32 %v2537_v25, %v1006_v34 }
 0x6ad   :  { %v1008_v37 = vadd.f32 %v2537_v25, %v1007_v11 }
 0x6af   :  { %v1012_v16 = vsel %vm1011_vm9, %v2537_v25, %v1008_v37 }
 0x6b0   :  { %v3269_v17 = vsel %vm1014_vm10, %v1016_v36, %v1012_v16 }
 0x6b1   :  { %v1054_v25 = vmul.f32 %v3269_v17, %v3205_v4 }
 0x6b9   :  { %v1062_v9 = vpop.permute.xlu0 %1061 }
 0x6ba   :  { %v1073_v51 = vmul.f32 %v1062_v9, %v3265_v63 }
 0x6bc   :  { %1081 = vrot.lane.b32.xlu0 %v1073_v51, %s2730_s11 }
 0x70e   :  { %v1064_v18 = vpop.permute.xlu1 %1063 }
 0x70f   :  { %v1074_v19 = vmul.f32 %v1064_v18, %v3269_v17 }
 0x711   :  { %1083 = vrot.lane.b32.xlu1 %v1074_v19, %s2730_s11 }
 0x71f   :  { %v934_v21 = vpop.f32.mrf.mxu1 }
 0x725   :  { %v959_v26 = vpop.f32.mrf.mxu2 }
 0x726   :  { %v971_v27 = vadd.f32 %v959_v26, %v391_v24 }
 0x727   :  { %v936_v28 = vpop.f32.mrf.mxu1 }
 0x728   :  { %2538 = vtanh.f32 %v971_v27  ;;  %v2383_v5 = vmul.f32 -1.442695, %v971_v27 }
 0x72d   :  { %v962_v38 = vpop.f32.mrf.mxu2 }
 0x72e   :  { %v2539_v46 = vpop.eup %2538  ;;  %v972_v30 = vadd.f32 %v962_v38, %v394_v20  ;;  %v1082_v35 = vpop.permute.xlu0 %1081 }
 0x72f   :  { %v3279_v39 = vadd.f32 %v1082_v35, %v1053_v29  ;;  %1065 = vrot.lane.b32.xlu2 %v2539_v46, %s2729_s4 }
 0x730   :  { %2540 = vtanh.f32 %v972_v30  ;;  %v2384_v41 = vmul.f32 -1.442695, %v972_v30 }
 0x731   :  { %2542 = vtanh.f32 %v3279_v39 }
 0x732   :  { %2544 = vpow2.f32 %v2383_v5 }
 0x733   :  { %2546 = vpow2.f32 %v2384_v41 }
 0x736   :  { %v2541_v3 = vpop.eup %2540 }
 0x737   :  { %v2543_v40 = vpop.eup %2542  ;;  %1067 = vrot.lane.b32.xlu2 %v2541_v3, %s2729_s4 }
 0x738   :  { %1105 = vrot.lane.b32.xlu1 %v2543_v40, %s2729_s4  ;;  %v2545_v23 = vpop.eup %2544 }
 0x739   :  { %v987_v42 = vadd.f32 1.0, %v2545_v23  ;;  %v2547_v43 = vpop.eup %2546 }
 0x73a   :  { %v988_v49 = vadd.f32 1.0, %v2547_v43 }
 0x73b   :  { %2548 = vrcp.f32 %v987_v42  ;;  %v1030_v37 = vand.u32 2147483648, %v987_v42  ;;  %vm1024_vm12 = vweird.f32 %v987_v42  ;;  %v1028_v15 = vand.u32 2147483647, %v987_v42 }
 0x73c   :  { %2550 = vrcp.f32 %v988_v49  ;;  %v1045_v26 = vand.u32 2147483648, %v988_v49  ;;  %vm1039_vm1 = vweird.f32 %v988_v49  ;;  %v1043_v28 = vand.u32 2147483647, %v988_v49 }
 0x73d   :  { %v1031_v18 = vor.u32 1.1754944e-38, %v1030_v37  ;;  %vm1029_vm14 = vcmp.eq.f32.partialorder %v1028_v15, 8.507059e+37 }
 0x73e   :  { %v1046_v38 = vor.u32 1.1754944e-38, %v1045_v26  ;;  %vm1044_vm3 = vcmp.eq.f32.partialorder %v1043_v28, 8.507059e+37 }
 0x741   :  { %v2549_v7 = vpop.eup %2548 }
 0x742   :  { %v1020_v9 = vmul.f32 %v2549_v7, %v987_v42  ;;  %v2551_v54 = vpop.eup %2550  ;;  %vm1025_vm11 = vweird.f32 %v2549_v7 }
 0x743   :  { %v1035_v44 = vmul.f32 %v2551_v54, %v988_v49  ;;  %vm1026_vm13 = vmor %vm1024_vm12, %vm1025_vm11  ;;  %vm1040_vm15 = vweird.f32 %v2551_v54 }
 0x744   :  { %v1021_v51 = vsub.f32 1.0, %v1020_v9  ;;  %vm1041_vm2 = vmor %vm1039_vm1, %vm1040_vm15 }
 0x745   :  { %v1036_v34 = vsub.f32 1.0, %v1035_v44 }
 0x746   :  { %v1022_v6 = vmul.f32 %v2549_v7, %v1021_v51  ;;  %v2721_v51 = vld [vmem:[%s3615_s3 + $0x28] sm:$0xff] }
 0x747   :  { %v1037_v36 = vmul.f32 %v2551_v54, %v1036_v34 }
 0x748   :  { %v1023_v32 = vadd.f32 %v2549_v7, %v1022_v6  ;;  %v2723_v6 = vld [vmem:[%s3615_s3 + $0x18] sm:$0xff] }
 0x749   :  { %v1038_v4 = vadd.f32 %v2551_v54, %v1037_v36 }
 0x74a   :  { %v1027_v16 = vsel %vm1026_vm13, %v2549_v7, %v1023_v32  ;;  %v2725_v32 = vld [vmem:[%s3615_s3 + $0x8] sm:$0xff] }
 0x74b   :  { %v1032_v21 = vsel %vm1029_vm14, %v1031_v18, %v1027_v16  ;;  %v1042_v20 = vsel %vm1041_vm2, %v2551_v54, %v1038_v4  ;;  %v2722_v54 = vld [vmem:[%s3615_s3 + $0x10] sm:$0xff]  ;;  %v314_v18 = vadd.f32 %v3235_v8, %v3000_v22  ;;  %v317_v8 = vadd.f32 %v3237_v47, %v3000_v22 }
 0x74c   :  { %v1047_v29 = vsel %vm1044_vm3, %v1046_v38, %v1042_v20  ;;  %v1055_v41 = vmul.f32 %v1032_v21, %v3214_v45  ;;  %v2718_v45 = vld [vmem:[%s3615_s3 + $0x30] sm:$0xff] }
 0x74d   :  { %v1056_v43 = vmul.f32 %v1047_v29, %v3219_v1  ;;  %v2719_v1 = vld [vmem:[%s3615_s3 + $0x38] sm:$0xff] }
 0x783   :  { %v1084_v11 = vpop.permute.xlu1 %1083 }
 0x784   :  { %v3287_v14 = vadd.f32 %v1084_v11, %v1054_v25  ;;  %v2724_v25 = vld [vmem:[%s3615_s3] sm:$0xff] }
 0x786   :  { %2552 = vtanh.f32 %v3287_v14 }
 0x789   :  { %v1066_v19 = vpop.permute.xlu2 %1065 }
 0x78a   :  { %v1075_v24 = vmul.f32 %v1066_v19, %v1032_v21 }
 0x78c   :  { %v2553_v27 = vpop.eup %2552  ;;  %1085 = vrot.lane.b32.xlu0 %v1075_v24, %s2730_s11 }
 0x78d   :  { %1107 = vrot.lane.b32.xlu2 %v2553_v27, %s2729_s4 }
 0x791   :  { %v1068_v46 = vpop.permute.xlu2 %1067 }
 0x792   :  { %v1076_v30 = vmul.f32 %v1068_v46, %v1047_v29 }
 0x794   :  { %1087 = vrot.lane.b32.xlu0 %v1076_v30, %s2730_s11 }
 0x7aa   :  { %v1106_v35 = vpop.permute.xlu1 %1105 }
 0x7ab   :  { %v1117_v3 = vmul.f32 %v1106_v35, %v3265_v63 }
 0x7ad   :  { %1125 = vrot.lane.b32.xlu2 %v1117_v3, %s2730_s11 }
 0x7e7   :  { %v1108_v40 = vpop.permute.xlu2 %1107 }
 0x7e8   :  { %v1118_v5 = vmul.f32 %v1108_v40, %v3269_v17  ;;  %v2720_v17 = vld [vmem:[%s3615_s3 + $0x20] sm:$0xff]  ;;  %s2731_s3 = smov 96  }
 0x7ea   :  { %1127 = vrot.lane.b32.xlu0 %v1118_v5, %s2730_s11 }
 0x7fe   :  { %v1086_v23 = vpop.permute.xlu0 %1085 }
 0x7ff   :  { %v3298_v42 = vadd.f32 %v1086_v23, %v1055_v41 }
 0x801   :  { %2554 = vtanh.f32 %v3298_v42 }
 0x806   :  { %v1088_v49 = vpop.permute.xlu0 %1087 }
 0x807   :  { %v2555_v7 = vpop.eup %2554  ;;  %v3302_v9 = vadd.f32 %v1088_v49, %v1056_v43  ;;  %v1126_v63 = vpop.permute.xlu2 %1125 }
 0x808   :  { %2385 = vmatmul.msk.f32.vlgmr.msra.gmra.mxu3 %vm229_vm0, %v1126_v63  ;;  %2389 = vmatmul.msk.f32.vlgmr.msrb.gmra.mxu0 %vm229_vm0, %v1126_v63 }
 0x809   :  { %2556 = vtanh.f32 %v3302_v9  ;;  %1109 = vrot.lane.b32.xlu1 %v2555_v7, %s2729_s4  ;;  %2073 = vmatpush.msra.mxu3 %v2718_v45 }
 0x80a   :  { %2100 = vmatpush.msrb.mxu0 %v2719_v1 }
 0x80b   :  { %2074 = vmatpush.msra.mxu3 %v2720_v17 }
 0x80c   :  { %2101 = vmatpush.msrb.mxu0 %v2721_v51 }
 0x80d   :  { %2075 = vmatpush.msra.mxu3 %v2722_v54 }
 0x80e   :  { %2102 = vmatpush.msrb.mxu0 %v2723_v6 }
 0x80f   :  { %v2557_v44 = vpop.eup %2556  ;;  %2076 = vmatpush.msra.mxu3 %v2724_v25 }
 0x810   :  { %2103 = vmatpush.msrb.mxu0 %v2725_v32 }
 0x811   :  { %1111 = vrot.lane.b32.xlu1 %v2557_v44, %s2729_s4 }
 0x85c   :  { %v1128_v34 = vpop.permute.xlu0 %1127 }
 0x85d   :  { %2386 = vmatmul.msk.f32.gmra.mxu3 %vm229_vm0, %v1128_v34  ;;  %2390 = vmatmul.msk.f32.gmra.mxu0 %vm229_vm0, %v1128_v34 }
 0x87b   :  { %v1110_v11 = vpop.permute.xlu1 %1109 }
 0x87c   :  { %v1119_v37 = vmul.f32 %v1110_v11, %v1032_v21 }
 0x87e   :  { %1129 = vrot.lane.b32.xlu2 %v1119_v37, %s2730_s11 }
 0x883   :  { %v1112_v15 = vpop.permute.xlu1 %1111 }
 0x884   :  { %v1120_v16 = vmul.f32 %v1112_v15, %v1047_v29 }
 0x885   :  { %v1185_v36 = vpop.f32.mrf.mxu0 }
 0x886   :  { %1131 = vrot.lane.b32.xlu0 %v1120_v16, %s2730_s11 }
 0x88b   :  { %v1158_v19 = vpop.f32.mrf.mxu3 }
 0x88c   :  { %v1197_v24 = vadd.f32 %v1158_v19, %v314_v18  ;;  %v385_v19 = vadd.f32 %v3113_v0, %v3127_v13 }
 0x88e   :  { %2558 = vtanh.f32 %v1197_v24  ;;  %v2393_v21 = vmul.f32 -1.442695, %v1197_v24 }
 0x890   :  { %2560 = vpow2.f32 %v2393_v21 }
 0x894   :  { %v2559_v4 = vpop.eup %2558 }
 0x895   :  { %1291 = vrot.lane.b32.xlu1 %v2559_v4, %s2729_s4 }
 0x896   :  { %v2561_v38 = vpop.eup %2560 }
 0x897   :  { %v1215_v29 = vadd.f32 1.0, %v2561_v38 }
 0x899   :  { %v1230_v41 = vand.u32 2147483648, %v1215_v29  ;;  %vm1224_vm5 = vweird.f32 %v1215_v29  ;;  %v1228_v23 = vand.u32 2147483647, %v1215_v29 }
 0x89b   :  { %v1231_v49 = vor.u32 1.1754944e-38, %v1230_v41  ;;  %vm1229_vm7 = vcmp.eq.f32.partialorder %v1228_v23, 8.507059e+37 }
 0x8d8   :  { %v1130_v26 = vpop.permute.xlu2 %1129 }
 0x8d9   :  { %2387 = vmatmul.msk.f32.gmra.mxu3 %vm229_vm0, %v1130_v26  ;;  %2391 = vmatmul.msk.f32.vlgmr.msra.gmra.mxu1 %vm229_vm0, %v1130_v26 }
 0x8da   :  { %v1187_v27 = vpop.f32.mrf.mxu0  ;;  %1843 = vmatpush.msra.mxu1 %v2718_v45 }
 0x8db   :  { %v388_v27 = vadd.f32 %v3115_v2, %v3127_v13 }
 0x8dc   :  { %1844 = vmatpush.msra.mxu1 %v2720_v17 }
 0x8de   :  { %1845 = vmatpush.msra.mxu1 %v2722_v54 }
 0x8e0   :  { %v1161_v28 = vpop.f32.mrf.mxu3  ;;  %1846 = vmatpush.msra.mxu1 %v2724_v25 }
 0x8e1   :  { %v1198_v20 = vadd.f32 %v1161_v28, %v317_v8 }
 0x8e3   :  { %2562 = vtanh.f32 %v1198_v20  ;;  %v2394_v1 = vmul.f32 -1.442695, %v1198_v20 }
 0x8e4   :  { %2564 = vrcp.f32 %v1215_v29 }
 0x8e5   :  { %2566 = vpow2.f32 %v2394_v1 }
 0x8e9   :  { %v2563_v46 = vpop.eup %2562 }
 0x8ea   :  { %1293 = vrot.lane.b32.xlu2 %v2563_v46, %s2729_s4  ;;  %v2565_v30 = vpop.eup %2564 }
 0x8eb   :  { %v1220_v35 = vmul.f32 %v2565_v30, %v1215_v29  ;;  %vm1225_vm4 = vweird.f32 %v2565_v30  ;;  %v2567_v17 = vpop.eup %2566 }
 0x8ec   :  { %vm1226_vm6 = vmor %vm1224_vm5, %vm1225_vm4  ;;  %v1216_v51 = vadd.f32 1.0, %v2567_v17 }
 0x8ed   :  { %v1221_v40 = vsub.f32 1.0, %v1220_v35 }
 0x8ee   :  { %2568 = vrcp.f32 %v1216_v51  ;;  %v1245_v34 = vand.u32 2147483648, %v1216_v51  ;;  %vm1239_vm9 = vweird.f32 %v1216_v51  ;;  %v1243_v11 = vand.u32 2147483647, %v1216_v51 }
 0x8ef   :  { %v1222_v5 = vmul.f32 %v2565_v30, %v1221_v40 }
 0x8f0   :  { %v1246_v15 = vor.u32 1.1754944e-38, %v1245_v34  ;;  %vm1244_vm11 = vcmp.eq.f32.partialorder %v1243_v11, 8.507059e+37 }
 0x8f1   :  { %v1223_v47 = vadd.f32 %v2565_v30, %v1222_v5 }
 0x8f3   :  { %v1227_v43 = vsel %vm1226_vm6, %v2565_v30, %v1223_v47 }
 0x8f4   :  { %v3347_v7 = vsel %vm1229_vm7, %v1231_v49, %v1227_v43  ;;  %v2569_v54 = vpop.eup %2568 }
 0x8f5   :  { %v1235_v6 = vmul.f32 %v2569_v54, %v1216_v51  ;;  %vm1240_vm8 = vweird.f32 %v2569_v54  ;;  %v1283_v20 = vmul.f32 %v3347_v7, %v3279_v39 }
 0x8f6   :  { %vm1241_vm10 = vmor %vm1239_vm9, %vm1240_vm8 }
 0x8f7   :  { %v1236_v44 = vsub.f32 1.0, %v1235_v6 }
 0x8f8   :  { %v1132_v3 = vpop.permute.xlu0 %1131 }
 0x8f9   :  { %2388 = vmatmul.msk.f32.gmra.mxu3 %vm229_vm0, %v1132_v3  ;;  %2392 = vmatmul.msk.f32.gmra.mxu1 %vm229_vm0, %v1132_v3  ;;  %v1237_v25 = vmul.f32 %v2569_v54, %v1236_v44 }
 0x8fb   :  { %v1238_v32 = vadd.f32 %v2569_v54, %v1237_v25 }
 0x8fd   :  { %v1242_v37 = vsel %vm1241_vm10, %v2569_v54, %v1238_v32 }
 0x8fe   :  { %v3351_v16 = vsel %vm1244_vm11, %v1246_v15, %v1242_v37 }
 0x8ff   :  { %v1284_v2 = vmul.f32 %v3351_v16, %v3287_v14 }
 0x907   :  { %v1292_v63 = vpop.permute.xlu1 %1291 }
 0x908   :  { %v1303_v45 = vmul.f32 %v1292_v63, %v3347_v7 }
 0x90a   :  { %1311 = vrot.lane.b32.xlu1 %v1303_v45, %s2730_s11 }
 0x944   :  { %v1294_v36 = vpop.permute.xlu2 %1293 }
 0x945   :  { %v1304_v18 = vmul.f32 %v1294_v36, %v3351_v16 }
 0x947   :  { %1313 = vrot.lane.b32.xlu2 %v1304_v18, %s2730_s11 }
 0x956   :  { %v1189_v24 = vpop.f32.mrf.mxu1 }
 0x957   :  { %v1201_v4 = vadd.f32 %v1189_v24, %v385_v19 }
 0x959   :  { %2570 = vtanh.f32 %v1201_v4  ;;  %v2395_v39 = vmul.f32 -1.442695, %v1201_v4 }
 0x95c   :  { %v1164_v26 = vpop.f32.mrf.mxu3 }
 0x95f   :  { %v2571_v21 = vpop.eup %2570 }
 0x960   :  { %1295 = vrot.lane.b32.xlu0 %v2571_v21, %s2729_s4 }
 0x976   :  { %v1192_v8 = vpop.f32.mrf.mxu1 }
 0x977   :  { %v1202_v28 = vadd.f32 %v1192_v8, %v388_v27 }
 0x979   :  { %2572 = vtanh.f32 %v1202_v28  ;;  %v2396_v49 = vmul.f32 -1.442695, %v1202_v28 }
 0x97c   :  { %v1166_v38 = vpop.f32.mrf.mxu3  ;;  %v1312_v29 = vpop.permute.xlu1 %1311 }
 0x97d   :  { %v3362_v46 = vadd.f32 %v1312_v29, %v1283_v20 }
 0x97f   :  { %v2573_v0 = vpop.eup %2572  ;;  %2574 = vtanh.f32 %v3362_v46 }
 0x980   :  { %1297 = vrot.lane.b32.xlu0 %v2573_v0, %s2729_s4 }
 0x985   :  { %v2575_v30 = vpop.eup %2574 }
 0x986   :  { %1335 = vrot.lane.b32.xlu2 %v2575_v30, %s2729_s4 }
 0x9a1   :  { %v1314_v35 = vpop.permute.xlu2 %1313 }
 0x9a2   :  { %v3369_v3 = vadd.f32 %v1314_v35, %v1284_v2 }
 0x9a4   :  { %2576 = vtanh.f32 %v3369_v3 }
 0x9a5   :  { %2578 = vpow2.f32 %v2395_v39 }
 0x9aa   :  { %v2577_v40 = vpop.eup %2576 }
 0x9ab   :  { %1337 = vrot.lane.b32.xlu0 %v2577_v40, %s2729_s4  ;;  %v2579_v5 = vpop.eup %2578 }
 0x9ac   :  { %v1217_v47 = vadd.f32 1.0, %v2579_v5 }
 0x9ae   :  { %2580 = vrcp.f32 %v1217_v47  ;;  %v1260_v45 = vand.u32 2147483648, %v1217_v47  ;;  %vm1254_vm13 = vweird.f32 %v1217_v47  ;;  %v1258_v1 = vand.u32 2147483647, %v1217_v47 }
 0x9af   :  { %2582 = vpow2.f32 %v2396_v49 }
 0x9b0   :  { %v1261_v54 = vor.u32 1.1754944e-38, %v1260_v45  ;;  %vm1259_vm15 = vcmp.eq.f32.partialorder %v1258_v1, 8.507059e+37  ;;  %v323_v1 = vadd.f32 %v3241_v10, %v3000_v22 }
 0x9b4   :  { %v2581_v41 = vpop.eup %2580 }
 0x9b5   :  { %v1250_v23 = vmul.f32 %v2581_v41, %v1217_v47  ;;  %vm1255_vm12 = vweird.f32 %v2581_v41  ;;  %v2583_v17 = vpop.eup %2582 }
 0x9b6   :  { %vm1256_vm14 = vmor %vm1254_vm13, %vm1255_vm12  ;;  %v1218_v6 = vadd.f32 1.0, %v2583_v17 }
 0x9b7   :  { %v1251_v43 = vsub.f32 1.0, %v1250_v23 }
 0x9b8   :  { %2584 = vrcp.f32 %v1218_v6  ;;  %v1275_v24 = vand.u32 2147483648, %v1218_v6  ;;  %vm1269_vm2 = vweird.f32 %v1218_v6  ;;  %v1273_v4 = vand.u32 2147483647, %v1218_v6 }
 0x9b9   :  { %v1252_v63 = vmul.f32 %v2581_v41, %v1251_v43 }
 0x9ba   :  { %v1276_v21 = vor.u32 1.1754944e-38, %v1275_v24  ;;  %vm1274_vm4 = vcmp.eq.f32.partialorder %v1273_v4, 8.507059e+37 }
 0x9bb   :  { %v1253_v14 = vadd.f32 %v2581_v41, %v1252_v63 }
 0x9bd   :  { %v1257_v51 = vsel %vm1256_vm14, %v2581_v41, %v1253_v14 }
 0x9be   :  { %v1262_v25 = vsel %vm1259_vm15, %v1261_v54, %v1257_v51  ;;  %v2585_v34 = vpop.eup %2584 }
 0x9bf   :  { %v1265_v11 = vmul.f32 %v2585_v34, %v1218_v6  ;;  %vm1270_vm1 = vweird.f32 %v2585_v34  ;;  %v1285_v38 = vmul.f32 %v1262_v25, %v3298_v42 }
 0x9c0   :  { %vm1271_vm3 = vmor %vm1269_vm2, %vm1270_vm1 }
 0x9c1   :  { %v1266_v36 = vsub.f32 1.0, %v1265_v11 }
 0x9c3   :  { %v1267_v18 = vmul.f32 %v2585_v34, %v1266_v36 }
 0x9c5   :  { %v1268_v19 = vadd.f32 %v2585_v34, %v1267_v18 }
 0x9c7   :  { %v1272_v26 = vsel %vm1271_vm3, %v2585_v34, %v1268_v19 }
 0x9c8   :  { %v1277_v27 = vsel %vm1274_vm4, %v1276_v21, %v1272_v26 }
 0x9c9   :  { %v1286_v35 = vmul.f32 %v1277_v27, %v3302_v9  ;;  %v320_v9 = vadd.f32 %v3239_v31, %v3000_v22 }
 0x9d2   :  { %v1296_v44 = vpop.permute.xlu0 %1295 }
 0x9d3   :  { %v1305_v32 = vmul.f32 %v1296_v44, %v1262_v25 }
 0x9d5   :  { %1315 = vrot.lane.b32.xlu1 %v1305_v32, %s2730_s11 }
 0x9e0   :  { %v1336_v37 = vpop.permute.xlu2 %1335 }
 0x9e1   :  { %v1347_v15 = vmul.f32 %v1336_v37, %v3347_v7 }
 0x9e3   :  { %1355 = vrot.lane.b32.xlu0 %v1347_v15, %s2730_s11 }
 0x9f2   :  { %v1298_v8 = vpop.permute.xlu0 %1297 }
 0x9f3   :  { %v1306_v28 = vmul.f32 %v1298_v8, %v1277_v27 }
 0x9f5   :  { %1317 = vrot.lane.b32.xlu1 %v1306_v28, %s2730_s11 }
 0xa1d   :  { %v1338_v20 = vpop.permute.xlu0 %1337 }
 0xa1e   :  { %v1348_v7 = vmul.f32 %v1338_v20, %v3351_v16 }
 0xa20   :  { %1357 = vrot.lane.b32.xlu1 %v1348_v7, %s2730_s11 }
 0xa47   :  { %v1316_v29 = vpop.permute.xlu1 %1315 }
 0xa48   :  { %v3380_v0 = vadd.f32 %v1316_v29, %v1285_v38 }
 0xa4a   :  { %2586 = vtanh.f32 %v3380_v0 }
 0xa50   :  { %v2587_v30 = vpop.eup %2586 }
 0xa51   :  { %1339 = vrot.lane.b32.xlu2 %v2587_v30, %s2729_s4 }
 0xa55   :  { %v1356_v2 = vpop.permute.xlu0 %1355 }
 0xa56   :  { %2397 = vmatmul.msk.f32.vlgmr.msrb.gmra.mxu1 %vm229_vm0, %v1356_v2  ;;  %2401 = vmatmul.msk.f32.vlgmr.msrb.gmra.mxu2 %vm229_vm0, %v1356_v2 }
 0xa67   :  { %v1318_v16 = vpop.permute.xlu1 %1317 }
 0xa68   :  { %v3387_v39 = vadd.f32 %v1318_v16, %v1286_v35 }
 0xa6a   :  { %2588 = vtanh.f32 %v3387_v39 }
 0xa70   :  { %v2589_v42 = vpop.eup %2588 }
 0xa71   :  { %1341 = vrot.lane.b32.xlu2 %v2589_v42, %s2729_s4 }
 0xa92   :  { %v1358_v40 = vpop.permute.xlu1 %1357 }
 0xa93   :  { %2398 = vmatmul.msk.f32.gmra.mxu1 %vm229_vm0, %v1358_v40  ;;  %2402 = vmatmul.msk.f32.gmra.mxu2 %vm229_vm0, %v1358_v40 }
 0xaab   :  { %v1340_v5 = vpop.permute.xlu2 %1339 }
 0xaac   :  { %v1349_v47 = vmul.f32 %v1340_v5, %v1262_v25 }
 0xaae   :  { %1359 = vrot.lane.b32.xlu0 %v1349_v47, %s2730_s11 }
 0xacb   :  { %v1342_v41 = vpop.permute.xlu2 %1341 }
 0xacc   :  { %v1350_v23 = vmul.f32 %v1342_v41, %v1277_v27 }
 0xace   :  { %1361 = vrot.lane.b32.xlu1 %v1350_v23, %s2730_s11 }
 0xad3   :  { %v1388_v43 = vpop.f32.mrf.mxu1 }
 0xad4   :  { %v1427_v49 = vadd.f32 %v1388_v43, %v320_v9 }
 0xad6   :  { %2590 = vtanh.f32 %v1427_v49  ;;  %v2405_v45 = vmul.f32 -1.442695, %v1427_v49 }
 0xad8   :  { %2592 = vpow2.f32 %v2405_v45 }
 0xad9   :  { %v1415_v63 = vpop.f32.mrf.mxu2 }
 0xada   :  { %v379_v63 = vadd.f32 %v3109_v61, %v3127_v13 }
 0xadc   :  { %v2591_v14 = vpop.eup %2590 }
 0xadd   :  { %1521 = vrot.lane.b32.xlu2 %v2591_v14, %s2729_s4 }
 0xade   :  { %v2593_v54 = vpop.eup %2592 }
 0xadf   :  { %v1445_v44 = vadd.f32 1.0, %v2593_v54 }
 0xae1   :  { %v1460_v15 = vand.u32 2147483648, %v1445_v44  ;;  %vm1454_vm6 = vweird.f32 %v1445_v44  ;;  %v1458_v36 = vand.u32 2147483647, %v1445_v44 }
 0xae3   :  { %v1461_v19 = vor.u32 1.1754944e-38, %v1460_v15  ;;  %vm1459_vm8 = vcmp.eq.f32.partialorder %v1458_v36, 8.507059e+37 }
 0xb10   :  { %v1391_v17 = vpop.f32.mrf.mxu1 }
 0xb11   :  { %v1428_v51 = vadd.f32 %v1391_v17, %v323_v1 }
 0xb13   :  { %2594 = vtanh.f32 %v1428_v51  ;;  %v2406_v27 = vmul.f32 -1.442695, %v1428_v51 }
 0xb14   :  { %2596 = vrcp.f32 %v1445_v44 }
 0xb15   :  { %2598 = vpow2.f32 %v2406_v27 }
 0xb16   :  { %v1417_v6 = vpop.f32.mrf.mxu2 }
 0xb19   :  { %v2595_v25 = vpop.eup %2594 }
 0xb1a   :  { %1523 = vrot.lane.b32.xlu0 %v2595_v25, %s2729_s4  ;;  %v2597_v32 = vpop.eup %2596 }
 0xb1b   :  { %v1450_v34 = vmul.f32 %v2597_v32, %v1445_v44  ;;  %vm1455_vm5 = vweird.f32 %v2597_v32  ;;  %v2599_v8 = vpop.eup %2598 }
 0xb1c   :  { %vm1456_vm7 = vmor %vm1454_vm6, %vm1455_vm5  ;;  %v1446_v28 = vadd.f32 1.0, %v2599_v8 }
 0xb1d   :  { %v1451_v11 = vsub.f32 1.0, %v1450_v34 }
 0xb1e   :  { %2600 = vrcp.f32 %v1446_v28  ;;  %v1475_v2 = vand.u32 2147483648, %v1446_v28  ;;  %vm1469_vm10 = vweird.f32 %v1446_v28  ;;  %v1473_v35 = vand.u32 2147483647, %v1446_v28 }
 0xb1f   :  { %v1452_v37 = vmul.f32 %v2597_v32, %v1451_v11 }
 0xb20   :  { %v1360_v31 = vpop.permute.xlu0 %1359  ;;  %v1476_v42 = vor.u32 1.1754944e-38, %v1475_v2  ;;  %vm1474_vm12 = vcmp.eq.f32.partialorder %v1473_v35, 8.507059e+37 }
 0xb21   :  { %2399 = vmatmul.msk.f32.gmra.mxu1 %vm229_vm0, %v1360_v31  ;;  %2403 = vmatmul.msk.f32.gmra.mxu2 %vm229_vm0, %v1360_v31  ;;  %v1453_v10 = vadd.f32 %v2597_v32, %v1452_v37 }
 0xb23   :  { %v1457_v18 = vsel %vm1456_vm7, %v2597_v32, %v1453_v10 }
 0xb24   :  { %v3403_v24 = vsel %vm1459_vm8, %v1461_v19, %v1457_v18  ;;  %v2601_v20 = vpop.eup %2600 }
 0xb25   :  { %v1465_v7 = vmul.f32 %v2601_v20, %v1446_v28  ;;  %vm1470_vm9 = vweird.f32 %v2601_v20  ;;  %v1513_v41 = vmul.f32 %v3403_v24, %v3362_v46  ;;  %v382_v46 = vadd.f32 %v3111_v62, %v3127_v13 }
 0xb26   :  { %vm1471_vm11 = vmor %vm1469_vm10, %vm1470_vm9 }
 0xb27   :  { %v1466_v38 = vsub.f32 1.0, %v1465_v7 }
 0xb29   :  { %v1467_v29 = vmul.f32 %v2601_v20, %v1466_v38 }
 0xb2b   :  { %v1468_v30 = vadd.f32 %v2601_v20, %v1467_v29 }
 0xb2d   :  { %v1472_v16 = vsel %vm1471_vm11, %v2601_v20, %v1468_v30 }
 0xb2e   :  { %v3409_v40 = vsel %vm1474_vm12, %v1476_v42, %v1472_v16 }
 0xb2f   :  { %v1514_v31 = vmul.f32 %v3409_v40, %v3369_v3 }
 0xb37   :  { %v1522_v4 = vpop.permute.xlu2 %1521 }
 0xb38   :  { %v1533_v26 = vmul.f32 %v1522_v4, %v3403_v24 }
 0xb3a   :  { %1541 = vrot.lane.b32.xlu2 %v1533_v26, %s2730_s11 }
 0xb40   :  { %v1362_v21 = vpop.permute.xlu1 %1361 }
 0xb41   :  { %2400 = vmatmul.msk.f32.gmra.mxu1 %vm229_vm0, %v1362_v21  ;;  %2404 = vmatmul.msk.f32.gmra.mxu2 %vm229_vm0, %v1362_v21 }
 0xb8c   :  { %v1524_v5 = vpop.permute.xlu0 %1523 }
 0xb8d   :  { %v1534_v47 = vmul.f32 %v1524_v5, %v3409_v40 }
 0xb8f   :  { %1543 = vrot.lane.b32.xlu0 %v1534_v47, %s2730_s11 }
 0xb94   :  { %v1542_v23 = vpop.permute.xlu2 %1541 }
 0xb95   :  { %v3415_v9 = vadd.f32 %v1542_v23, %v1513_v41 }
 0xb97   :  { %2602 = vtanh.f32 %v3415_v9 }
 0xb9d   :  { %v2603_v43 = vpop.eup %2602 }
 0xb9e   :  { %v1394_v49 = vpop.f32.mrf.mxu1  ;;  %1565 = vrot.lane.b32.xlu0 %v2603_v43, %s2729_s4 }
 0xba4   :  { %v1419_v14 = vpop.f32.mrf.mxu2 }
 0xba5   :  { %v1431_v45 = vadd.f32 %v1419_v14, %v379_v63 }
 0xba7   :  { %2604 = vtanh.f32 %v1431_v45  ;;  %v2407_v44 = vmul.f32 -1.442695, %v1431_v45 }
 0xbad   :  { %v2605_v1 = vpop.eup %2604 }
 0xbae   :  { %1525 = vrot.lane.b32.xlu1 %v2605_v1, %s2729_s4 }
 0xbbe   :  { %v1396_v17 = vpop.f32.mrf.mxu1 }
 0xbc4   :  { %v1422_v51 = vpop.f32.mrf.mxu2 }
 0xbc5   :  { %v1432_v54 = vadd.f32 %v1422_v51, %v382_v46 }
 0xbc7   :  { %2606 = vtanh.f32 %v1432_v54  ;;  %v2408_v18 = vmul.f32 -1.442695, %v1432_v54 }
 0xbc8   :  { %2608 = vpow2.f32 %v2407_v44 }
 0xbcd   :  { %v2607_v6 = vpop.eup %2606 }
 0xbce   :  { %1527 = vrot.lane.b32.xlu1 %v2607_v6, %s2729_s4  ;;  %v2609_v25 = vpop.eup %2608 }
 0xbcf   :  { %v1447_v61 = vadd.f32 1.0, %v2609_v25 }
 0xbd1   :  { %2610 = vrcp.f32 %v1447_v61  ;;  %v1490_v4 = vand.u32 2147483648, %v1447_v61  ;;  %vm1484_vm14 = vweird.f32 %v1447_v61  ;;  %v1488_v26 = vand.u32 2147483647, %v1447_v61 }
 0xbd3   :  { %v1491_v8 = vor.u32 1.1754944e-38, %v1490_v4  ;;  %vm1489_vm1 = vcmp.eq.f32.partialorder %v1488_v26, 8.507059e+37 }
 0xbd7   :  { %v2611_v62 = vpop.eup %2610 }
 0xbd8   :  { %v1480_v37 = vmul.f32 %v2611_v62, %v1447_v61  ;;  %vm1485_vm13 = vweird.f32 %v2611_v62 }
 0xbd9   :  { %vm1486_vm15 = vmor %vm1484_vm14, %vm1485_vm13 }
 0xbda   :  { %v1481_v36 = vsub.f32 1.0, %v1480_v37 }
 0xbdc   :  { %v1482_v19 = vmul.f32 %v2611_v62, %v1481_v36  ;;  %v329_v36 = vadd.f32 %v3247_v50, %v3000_v22 }
 0xbde   :  { %v1483_v3 = vadd.f32 %v2611_v62, %v1482_v19 }
 0xbe0   :  { %v1487_v27 = vsel %vm1486_vm15, %v2611_v62, %v1483_v3 }
 0xbe1   :  { %v1492_v7 = vsel %vm1489_vm1, %v1491_v8, %v1487_v27 }
 0xbe2   :  { %v1515_v49 = vmul.f32 %v1492_v7, %v3380_v0 }
 0xc01   :  { %v1544_v32 = vpop.permute.xlu0 %1543 }
 0xc02   :  { %v3427_v34 = vadd.f32 %v1544_v32, %v1514_v31 }
 0xc04   :  { %2612 = vtanh.f32 %v3427_v34 }
 0xc05   :  { %2614 = vpow2.f32 %v2408_v18 }
 0xc0a   :  { %v2613_v11 = vpop.eup %2612 }
 0xc0b   :  { %1567 = vrot.lane.b32.xlu1 %v2613_v11, %s2729_s4  ;;  %v2615_v21 = vpop.eup %2614 }
 0xc0c   :  { %v1448_v28 = vadd.f32 1.0, %v2615_v21 }
 0xc0e   :  { %2616 = vrcp.f32 %v1448_v28  ;;  %v1505_v16 = vand.u32 2147483648, %v1448_v28  ;;  %vm1499_vm3 = vweird.f32 %v1448_v28  ;;  %v1503_v42 = vand.u32 2147483647, %v1448_v28 }
 0xc10   :  { %v1566_v10 = vpop.permute.xlu0 %1565  ;;  %v1506_v47 = vor.u32 1.1754944e-38, %v1505_v16  ;;  %vm1504_vm5 = vcmp.eq.f32.partialorder %v1503_v42, 8.507059e+37 }
 0xc11   :  { %v1577_v15 = vmul.f32 %v1566_v10, %v3403_v24 }
 0xc13   :  { %1585 = vrot.lane.b32.xlu1 %v1577_v15, %s2730_s11 }
 0xc14   :  { %v2617_v38 = vpop.eup %2616 }
 0xc15   :  { %v1495_v29 = vmul.f32 %v2617_v38, %v1448_v28  ;;  %vm1500_vm2 = vweird.f32 %v2617_v38 }
 0xc16   :  { %vm1501_vm4 = vmor %vm1499_vm3, %vm1500_vm2 }
 0xc17   :  { %v1496_v30 = vsub.f32 1.0, %v1495_v29 }
 0xc19   :  { %v1497_v2 = vmul.f32 %v2617_v38, %v1496_v30 }
 0xc1b   :  { %v1498_v35 = vadd.f32 %v2617_v38, %v1497_v2 }
 0xc1d   :  { %v1502_v5 = vsel %vm1501_vm4, %v2617_v38, %v1498_v35 }
 0xc1e   :  { %v1507_v41 = vsel %vm1504_vm5, %v1506_v47, %v1502_v5 }
 0xc1f   :  { %v1516_v0 = vmul.f32 %v1507_v41, %v3387_v39  ;;  %v326_v39 = vadd.f32 %v3243_v48, %v3000_v22 }
 0xc20   :  { %v1526_v20 = vpop.permute.xlu1 %1525 }
 0xc21   :  { %v1535_v24 = vmul.f32 %v1526_v20, %v1492_v7 }
 0xc23   :  { %1545 = vrot.lane.b32.xlu2 %v1535_v24, %s2730_s11 }
 0xc40   :  { %v1528_v23 = vpop.permute.xlu1 %1527 }
 0xc41   :  { %v1536_v43 = vmul.f32 %v1528_v23, %v1507_v41 }
 0xc43   :  { %1547 = vrot.lane.b32.xlu2 %v1536_v43, %s2730_s11 }
 0xc7d   :  { %v1546_v63 = vpop.permute.xlu2 %1545  ;;  %v1568_v14 = vpop.permute.xlu1 %1567 }
 0xc7e   :  { %v3436_v45 = vadd.f32 %v1546_v63, %v1515_v49  ;;  %v1578_v1 = vmul.f32 %v1568_v14, %v3409_v40 }
 0xc80   :  { %2618 = vtanh.f32 %v3436_v45  ;;  %1587 = vrot.lane.b32.xlu2 %v1578_v1, %s2730_s11 }
 0xc85   :  { %v1586_v17 = vpop.permute.xlu1 %1585 }
 0xc86   :  { %v2619_v46 = vpop.eup %2618  ;;  %2409 = vmatmul.msk.f32.vlgmr.msrb.gmra.mxu3 %vm229_vm0, %v1586_v17  ;;  %2413 = vmatmul.msk.f32.vlgmr.msra.gmra.mxu0 %vm229_vm0, %v1586_v17 }
 0xc87   :  { %1569 = vrot.lane.b32.xlu0 %v2619_v46, %s2729_s4 }
 0xc9d   :  { %v1548_v51 = vpop.permute.xlu2 %1547 }
 0xc9e   :  { %v3445_v54 = vadd.f32 %v1548_v51, %v1516_v0 }
 0xca0   :  { %2620 = vtanh.f32 %v3445_v54 }
 0xca6   :  { %v2621_v40 = vpop.eup %2620 }
 0xca7   :  { %1571 = vrot.lane.b32.xlu0 %v2621_v40, %s2729_s4  ;;  %v373_v40 = vadd.f32 %v3105_v59, %v3127_v13 }
 0xcda   :  { %v1588_v6 = vpop.permute.xlu2 %1587 }
 0xcdb   :  { %2410 = vmatmul.msk.f32.gmra.mxu3 %vm229_vm0, %v1588_v6  ;;  %2414 = vmatmul.msk.f32.gmra.mxu0 %vm229_vm0, %v1588_v6 }
 0xcf9   :  { %v1570_v44 = vpop.permute.xlu0 %1569 }
 0xcfa   :  { %v1579_v25 = vmul.f32 %v1570_v44, %v1492_v7 }
 0xcfc   :  { %1589 = vrot.lane.b32.xlu1 %v1579_v25, %s2730_s11 }
 0xd03   :  { %v1645_v61 = vpop.f32.mrf.mxu0 }
 0xd04   :  { %v376_v61 = vadd.f32 %v3107_v60, %v3127_v13 }
 0xd09   :  { %v1618_v31 = vpop.f32.mrf.mxu3 }
 0xd0a   :  { %v1657_v32 = vadd.f32 %v1618_v31, %v326_v39 }
 0xd0c   :  { %2622 = vtanh.f32 %v1657_v32  ;;  %v2417_v10 = vmul.f32 -1.442695, %v1657_v32 }
 0xd0e   :  { %2624 = vpow2.f32 %v2417_v10 }
 0xd12   :  { %v2623_v62 = vpop.eup %2622 }
 0xd13   :  { %1751 = vrot.lane.b32.xlu0 %v2623_v62, %s2729_s4 }
 0xd14   :  { %v2625_v48 = vpop.eup %2624 }
 0xd15   :  { %v1675_v3 = vadd.f32 1.0, %v2625_v48 }
 0xd17   :  { %v1690_v7 = vand.u32 2147483648, %v1675_v3  ;;  %vm1684_vm7 = vweird.f32 %v1675_v3  ;;  %v1688_v24 = vand.u32 2147483647, %v1675_v3 }
 0xd19   :  { %v1572_v11 = vpop.permute.xlu0 %1571  ;;  %v1691_v29 = vor.u32 1.1754944e-38, %v1690_v7  ;;  %vm1689_vm9 = vcmp.eq.f32.partialorder %v1688_v24, 8.507059e+37 }
 0xd1a   :  { %v1580_v37 = vmul.f32 %v1572_v11, %v1507_v41 }
 0xd1c   :  { %1591 = vrot.lane.b32.xlu2 %v1580_v37, %s2730_s11 }
 0xd58   :  { %v1647_v15 = vpop.f32.mrf.mxu0 }
 0xd5e   :  { %v1621_v18 = vpop.f32.mrf.mxu3 }
 0xd5f   :  { %v1658_v19 = vadd.f32 %v1621_v18, %v329_v36 }
 0xd61   :  { %2626 = vtanh.f32 %v1658_v19  ;;  %v2418_v16 = vmul.f32 -1.442695, %v1658_v19 }
 0xd62   :  { %2628 = vrcp.f32 %v1675_v3 }
 0xd63   :  { %2630 = vpow2.f32 %v2418_v16 }
 0xd67   :  { %v2627_v4 = vpop.eup %2626 }
 0xd68   :  { %1753 = vrot.lane.b32.xlu1 %v2627_v4, %s2729_s4  ;;  %v2629_v21 = vpop.eup %2628 }
 0xd69   :  { %v1680_v27 = vmul.f32 %v2629_v21, %v1675_v3  ;;  %vm1685_vm6 = vweird.f32 %v2629_v21  ;;  %v2631_v42 = vpop.eup %2630 }
 0xd6a   :  { %vm1686_vm8 = vmor %vm1684_vm7, %vm1685_vm6  ;;  %v1676_v5 = vadd.f32 1.0, %v2631_v42 }
 0xd6b   :  { %v1681_v28 = vsub.f32 1.0, %v1680_v27 }
 0xd6c   :  { %2632 = vrcp.f32 %v1676_v5  ;;  %v1705_v63 = vand.u32 2147483648, %v1676_v5  ;;  %vm1699_vm11 = vweird.f32 %v1676_v5  ;;  %v1703_v14 = vand.u32 2147483647, %v1676_v5 }
 0xd6d   :  { %v1682_v50 = vmul.f32 %v2629_v21, %v1681_v28 }
 0xd6e   :  { %v1590_v26 = vpop.permute.xlu1 %1589  ;;  %v1706_v17 = vor.u32 1.1754944e-38, %v1705_v63  ;;  %vm1704_vm13 = vcmp.eq.f32.partialorder %v1703_v14, 8.507059e+37 }
 0xd6f   :  { %2411 = vmatmul.msk.f32.gmra.mxu3 %vm229_vm0, %v1590_v26  ;;  %2415 = vmatmul.msk.f32.gmra.mxu0 %vm229_vm0, %v1590_v26  ;;  %v1683_v20 = vadd.f32 %v2629_v21, %v1682_v50 }
 0xd71   :  { %v1687_v38 = vsel %vm1686_vm8, %v2629_v21, %v1683_v20 }
 0xd72   :  { %v3463_v30 = vsel %vm1689_vm9, %v1691_v29, %v1687_v38  ;;  %v2633_v47 = vpop.eup %2632 }
 0xd73   :  { %v1695_v41 = vmul.f32 %v2633_v47, %v1676_v5  ;;  %vm1700_vm10 = vweird.f32 %v2633_v47  ;;  %v1743_v62 = vmul.f32 %v3463_v30, %v3415_v9 }
 0xd74   :  { %vm1701_vm12 = vmor %vm1699_vm11, %vm1700_vm10 }
 0xd75   :  { %v1696_v23 = vsub.f32 1.0, %v1695_v41 }
 0xd76   :  { %v1592_v8 = vpop.permute.xlu2 %1591 }
 0xd77   :  { %2412 = vmatmul.msk.f32.gmra.mxu3 %vm229_vm0, %v1592_v8  ;;  %2416 = vmatmul.msk.f32.gmra.mxu0 %vm229_vm0, %v1592_v8  ;;  %v1697_v43 = vmul.f32 %v2633_v47, %v1696_v23 }
 0xd79   :  { %v1698_v49 = vadd.f32 %v2633_v47, %v1697_v43 }
 0xd7b   :  { %v1702_v1 = vsel %vm1701_vm12, %v2633_v47, %v1698_v49 }
 0xd7c   :  { %v3467_v46 = vsel %vm1704_vm13, %v1706_v17, %v1702_v1 }
 0xd7d   :  { %v1744_v29 = vmul.f32 %v3467_v46, %v3427_v34 }
 0xd85   :  { %v1752_v2 = vpop.permute.xlu0 %1751 }
 0xd86   :  { %v1763_v35 = vmul.f32 %v1752_v2, %v3463_v30 }
 0xd88   :  { %1771 = vrot.lane.b32.xlu0 %v1763_v35, %s2730_s11 }
 0xdda   :  { %v1754_v0 = vpop.permute.xlu1 %1753 }
 0xddb   :  { %v1764_v51 = vmul.f32 %v1754_v0, %v3467_v46 }
 0xddd   :  { %1773 = vrot.lane.b32.xlu1 %v1764_v51, %s2730_s11 }
 0xdec   :  { %v1649_v6 = vpop.f32.mrf.mxu0 }
 0xded   :  { %v1661_v44 = vadd.f32 %v1649_v6, %v373_v40 }
 0xdef   :  { %2634 = vtanh.f32 %v1661_v44  ;;  %v2419_v60 = vmul.f32 -1.442695, %v1661_v44 }
 0xdf2   :  { %v1624_v25 = vpop.f32.mrf.mxu3 }
 0xdf4   :  { %v1652_v39 = vpop.f32.mrf.mxu0 }
 0xdf5   :  { %v2635_v31 = vpop.eup %2634  ;;  %v1662_v32 = vadd.f32 %v1652_v39, %v376_v61 }
 0xdf6   :  { %1755 = vrot.lane.b32.xlu2 %v2635_v31, %s2729_s4 }
 0xdf7   :  { %2636 = vtanh.f32 %v1662_v32  ;;  %v2420_v36 = vmul.f32 -1.442695, %v1662_v32 }
 0xdfa   :  { %v1626_v11 = vpop.f32.mrf.mxu3  ;;  %v1772_v37 = vpop.permute.xlu0 %1771 }
 0xdfb   :  { %v3478_v10 = vadd.f32 %v1772_v37, %v1743_v62 }
 0xdfd   :  { %v2637_v59 = vpop.eup %2636  ;;  %2638 = vtanh.f32 %v3478_v10 }
 0xdfe   :  { %1757 = vrot.lane.b32.xlu2 %v2637_v59, %s2729_s4  ;;  %2640 = vpow2.f32 %v2419_v60 }
 0xdff   :  { %2642 = vpow2.f32 %v2420_v36 }
 0xe03   :  { %v2639_v15 = vpop.eup %2638 }
 0xe04   :  { %1795 = vrot.lane.b32.xlu1 %v2639_v15, %s2729_s4  ;;  %v2641_v18 = vpop.eup %2640  ;;  %v332_v15 = vadd.f32 %v3249_v53, %v3000_v22 }
 0xe05   :  { %v1677_v19 = vadd.f32 1.0, %v2641_v18  ;;  %v2643_v9 = vpop.eup %2642 }
 0xe06   :  { %v1678_v48 = vadd.f32 1.0, %v2643_v9 }
 0xe07   :  { %2644 = vrcp.f32 %v1677_v19  ;;  %v1720_v20 = vand.u32 2147483648, %v1677_v19  ;;  %vm1714_vm15 = vweird.f32 %v1677_v19  ;;  %v1718_v7 = vand.u32 2147483647, %v1677_v19 }
 0xe08   :  { %2646 = vrcp.f32 %v1678_v48  ;;  %v1735_v23 = vand.u32 2147483648, %v1678_v48  ;;  %vm1729_vm4 = vweird.f32 %v1678_v48  ;;  %v1733_v43 = vand.u32 2147483647, %v1678_v48 }
 0xe09   :  { %v1721_v2 = vor.u32 1.1754944e-38, %v1720_v20  ;;  %vm1719_vm2 = vcmp.eq.f32.partialorder %v1718_v7, 8.507059e+37 }
 0xe0a   :  { %v1736_v34 = vor.u32 1.1754944e-38, %v1735_v23  ;;  %vm1734_vm6 = vcmp.eq.f32.partialorder %v1733_v43, 8.507059e+37 }
 0xe0d   :  { %v2645_v3 = vpop.eup %2644 }
 0xe0e   :  { %v1710_v4 = vmul.f32 %v2645_v3, %v1677_v19  ;;  %v2647_v21 = vpop.eup %2646  ;;  %vm1715_vm14 = vweird.f32 %v2645_v3 }
 0xe0f   :  { %v1725_v8 = vmul.f32 %v2647_v21, %v1678_v48  ;;  %vm1716_vm1 = vmor %vm1714_vm15, %vm1715_vm14  ;;  %vm1730_vm3 = vweird.f32 %v2647_v21 }
 0xe10   :  { %v1711_v26 = vsub.f32 1.0, %v1710_v4  ;;  %vm1731_vm5 = vmor %vm1729_vm4, %vm1730_vm3 }
 0xe11   :  { %v1726_v50 = vsub.f32 1.0, %v1725_v8 }
 0xe12   :  { %v1712_v27 = vmul.f32 %v2645_v3, %v1711_v26 }
 0xe13   :  { %v1727_v38 = vmul.f32 %v2647_v21, %v1726_v50 }
 0xe14   :  { %v1713_v28 = vadd.f32 %v2645_v3, %v1712_v27 }
 0xe15   :  { %v1728_v41 = vadd.f32 %v2647_v21, %v1727_v38 }
 0xe16   :  { %v1717_v24 = vsel %vm1716_vm1, %v2645_v3, %v1713_v28  ;;  %v335_v3 = vadd.f32 %v3251_v33, %v3000_v22 }
 0xe17   :  { %v1722_v5 = vsel %vm1719_vm2, %v1721_v2, %v1717_v24  ;;  %v1732_v49 = vsel %vm1731_vm5, %v2647_v21, %v1728_v41 }
 0xe18   :  { %v1737_v14 = vsel %vm1734_vm6, %v1736_v34, %v1732_v49  ;;  %v1745_v44 = vmul.f32 %v1722_v5, %v3436_v45 }
 0xe19   :  { %v1746_v39 = vmul.f32 %v1737_v14, %v3445_v54 }
 0xe4f   :  { %v1774_v35 = vpop.permute.xlu1 %1773 }
 0xe50   :  { %v3485_v16 = vadd.f32 %v1774_v35, %v1744_v29  ;;  %v1756_v42 = vpop.permute.xlu2 %1755 }
 0xe51   :  { %v1765_v47 = vmul.f32 %v1756_v42, %v1722_v5 }
 0xe52   :  { %2648 = vtanh.f32 %v3485_v16 }
 0xe53   :  { %1775 = vrot.lane.b32.xlu0 %v1765_v47, %s2730_s11 }
 0xe58   :  { %v2649_v63 = vpop.eup %2648  ;;  %v1758_v1 = vpop.permute.xlu2 %1757 }
 0xe59   :  { %v1766_v17 = vmul.f32 %v1758_v1, %v1737_v14  ;;  %1797 = vrot.lane.b32.xlu2 %v2649_v63, %s2729_s4 }
 0xe5b   :  { %1777 = vrot.lane.b32.xlu0 %v1766_v17, %s2730_s11 }
 0xe76   :  { %v1796_v0 = vpop.permute.xlu1 %1795 }
 0xe77   :  { %v1807_v51 = vmul.f32 %v1796_v0, %v3463_v30 }
 0xe79   :  { %1815 = vrot.lane.b32.xlu2 %v1807_v51, %s2730_s11 }
 0xeb3   :  { %v1798_v40 = vpop.permute.xlu2 %1797 }
 0xeb4   :  { %v1808_v6 = vmul.f32 %v1798_v40, %v3467_v46 }
 0xeb6   :  { %1817 = vrot.lane.b32.xlu0 %v1808_v6, %s2730_s11 }
 0xec5   :  { %v1776_v25 = vpop.permute.xlu0 %1775 }
 0xec6   :  { %v3496_v61 = vadd.f32 %v1776_v25, %v1745_v44 }
 0xec8   :  { %2650 = vtanh.f32 %v3496_v61 }
 0xecd   :  { %v1778_v31 = vpop.permute.xlu0 %1777 }
 0xece   :  { %v2651_v32 = vpop.eup %2650  ;;  %v3500_v62 = vadd.f32 %v1778_v31, %v1746_v39  ;;  %v367_v31 = vadd.f32 %v3101_v57, %v3127_v13 }
 0xecf   :  { %1799 = vrot.lane.b32.xlu1 %v2651_v32, %s2729_s4 }
 0xed0   :  { %2652 = vtanh.f32 %v3500_v62 }
 0xed3   :  { %v1816_v30 = vpop.permute.xlu2 %1815 }
 0xed4   :  { %2421 = vmatmul.msk.f32.vlgmr.msra.gmra.mxu1 %vm229_vm0, %v1816_v30  ;;  %2425 = vmatmul.msk.f32.vlgmr.msra.gmra.mxu2 %vm229_vm0, %v1816_v30 }
 0xed6   :  { %v2653_v45 = vpop.eup %2652 }
 0xed7   :  { %1801 = vrot.lane.b32.xlu1 %v2653_v45, %s2729_s4 }
 0xf28   :  { %v1818_v46 = vpop.permute.xlu0 %1817 }
 0xf29   :  { %2422 = vmatmul.msk.f32.gmra.mxu1 %vm229_vm0, %v1818_v46  ;;  %2426 = vmatmul.msk.f32.gmra.mxu2 %vm229_vm0, %v1818_v46 }
 0xf41   :  { %v1800_v54 = vpop.permute.xlu1 %1799 }
 0xf42   :  { %v1809_v11 = vmul.f32 %v1800_v54, %v1722_v5  ;;  %v370_v54 = vadd.f32 %v3103_v58, %v3127_v13 }
 0xf44   :  { %1819 = vrot.lane.b32.xlu2 %v1809_v11, %s2730_s11 }
 0xf49   :  { %v1802_v37 = vpop.permute.xlu1 %1801 }
 0xf4a   :  { %v1810_v59 = vmul.f32 %v1802_v37, %v1737_v14 }
 0xf4c   :  { %1821 = vrot.lane.b32.xlu0 %v1810_v59, %s2730_s11 }
 0xf51   :  { %v1848_v60 = vpop.f32.mrf.mxu1 }
 0xf52   :  { %v1887_v36 = vadd.f32 %v1848_v60, %v332_v15 }
 0xf54   :  { %2654 = vtanh.f32 %v1887_v36  ;;  %v2429_v48 = vmul.f32 -1.442695, %v1887_v36 }
 0xf56   :  { %2656 = vpow2.f32 %v2429_v48 }
 0xf57   :  { %v1875_v18 = vpop.f32.mrf.mxu2 }
 0xf5a   :  { %v2655_v19 = vpop.eup %2654 }
 0xf5b   :  { %1981 = vrot.lane.b32.xlu1 %v2655_v19, %s2729_s4 }
 0xf5c   :  { %v2657_v53 = vpop.eup %2656 }
 0xf5d   :  { %v1905_v27 = vadd.f32 1.0, %v2657_v53 }
 0xf5f   :  { %v1920_v38 = vand.u32 2147483648, %v1905_v27  ;;  %vm1914_vm8 = vweird.f32 %v1905_v27  ;;  %v1918_v29 = vand.u32 2147483647, %v1905_v27 }
 0xf61   :  { %v1921_v35 = vor.u32 1.1754944e-38, %v1920_v38  ;;  %vm1919_vm10 = vcmp.eq.f32.partialorder %v1918_v29, 8.507059e+37 }
 0xf9e   :  { %v1820_v9 = vpop.permute.xlu2 %1819 }
 0xf9f   :  { %2423 = vmatmul.msk.f32.gmra.mxu1 %vm229_vm0, %v1820_v9  ;;  %2427 = vmatmul.msk.f32.gmra.mxu2 %vm229_vm0, %v1820_v9 }
 0xfa6   :  { %v1851_v4 = vpop.f32.mrf.mxu1 }
 0xfa7   :  { %v1888_v26 = vadd.f32 %v1851_v4, %v335_v3 }
 0xfa9   :  { %2658 = vtanh.f32 %v1888_v26  ;;  %v2430_v41 = vmul.f32 -1.442695, %v1888_v26 }
 0xfaa   :  { %2660 = vrcp.f32 %v1905_v27 }
 0xfab   :  { %2662 = vpow2.f32 %v2430_v41 }
 0xfac   :  { %v1877_v21 = vpop.f32.mrf.mxu2 }
 0xfaf   :  { %v2659_v8 = vpop.eup %2658 }
 0xfb0   :  { %1983 = vrot.lane.b32.xlu2 %v2659_v8, %s2729_s4  ;;  %v2661_v28 = vpop.eup %2660 }
 0xfb1   :  { %v1910_v50 = vmul.f32 %v2661_v28, %v1905_v27  ;;  %vm1915_vm7 = vweird.f32 %v2661_v28  ;;  %v2663_v23 = vpop.eup %2662 }
 0xfb2   :  { %vm1916_vm9 = vmor %vm1914_vm8, %vm1915_vm7  ;;  %v1906_v43 = vadd.f32 1.0, %v2663_v23 }
 0xfb3   :  { %v1911_v7 = vsub.f32 1.0, %v1910_v50 }
 0xfb4   :  { %2664 = vrcp.f32 %v1906_v43  ;;  %v1935_v17 = vand.u32 2147483648, %v1906_v43  ;;  %vm1929_vm12 = vweird.f32 %v1906_v43  ;;  %v1933_v0 = vand.u32 2147483647, %v1906_v43 }
 0xfb5   :  { %v1912_v24 = vmul.f32 %v2661_v28, %v1911_v7 }
 0xfb6   :  { %v1936_v40 = vor.u32 1.1754944e-38, %v1935_v17  ;;  %vm1934_vm14 = vcmp.eq.f32.partialorder %v1933_v0, 8.507059e+37 }
 0xfb7   :  { %v1913_v33 = vadd.f32 %v2661_v28, %v1912_v24 }
 0xfb9   :  { %v1917_v2 = vsel %vm1916_vm9, %v2661_v28, %v1913_v33 }
 0xfba   :  { %v3521_v42 = vsel %vm1919_vm10, %v1921_v35, %v1917_v2  ;;  %v2665_v49 = vpop.eup %2664 }
 0xfbb   :  { %v1925_v34 = vmul.f32 %v2665_v49, %v1906_v43  ;;  %vm1930_vm11 = vweird.f32 %v2665_v49  ;;  %v1973_v11 = vmul.f32 %v3521_v42, %v3478_v10 }
 0xfbc   :  { %vm1931_vm13 = vmor %vm1929_vm12, %vm1930_vm11 }
 0xfbd   :  { %v1926_v63 = vsub.f32 1.0, %v1925_v34 }
 0xfbe   :  { %v1822_v20 = vpop.permute.xlu0 %1821 }
 0xfbf   :  { %2424 = vmatmul.msk.f32.gmra.mxu1 %vm229_vm0, %v1822_v20  ;;  %2428 = vmatmul.msk.f32.gmra.mxu2 %vm229_vm0, %v1822_v20  ;;  %v1927_v14 = vmul.f32 %v2665_v49, %v1926_v63 }
 0xfc1   :  { %v1928_v1 = vadd.f32 %v2665_v49, %v1927_v14 }
 0xfc3   :  { %v1932_v51 = vsel %vm1931_vm13, %v2665_v49, %v1928_v1 }
 0xfc4   :  { %v3525_v6 = vsel %vm1934_vm14, %v1936_v40, %v1932_v51 }
 0xfc5   :  { %v1974_v58 = vmul.f32 %v3525_v6, %v3485_v16 }
 0xfcd   :  { %v1982_v5 = vpop.permute.xlu1 %1981 }
 0xfce   :  { %v1993_v47 = vmul.f32 %v1982_v5, %v3521_v42 }
 0xfd0   :  { %2001 = vrot.lane.b32.xlu1 %v1993_v47, %s2730_s11 }
0x100a   :  { %v1984_v44 = vpop.permute.xlu2 %1983 }
0x100b   :  { %v1994_v25 = vmul.f32 %v1984_v44, %v3525_v6 }
0x100d   :  { %2003 = vrot.lane.b32.xlu2 %v1994_v25, %s2730_s11 }
0x101c   :  { %v1854_v39 = vpop.f32.mrf.mxu1 }
0x1022   :  { %v1879_v32 = vpop.f32.mrf.mxu2 }
0x1023   :  { %v1891_v30 = vadd.f32 %v1879_v32, %v367_v31 }
0x1025   :  { %2666 = vtanh.f32 %v1891_v30  ;;  %v2431_v9 = vmul.f32 -1.442695, %v1891_v30 }
0x102b   :  { %v2667_v45 = vpop.eup %2666 }
0x102c   :  { %1985 = vrot.lane.b32.xlu0 %v2667_v45, %s2729_s4 }
0x103c   :  { %v1856_v46 = vpop.f32.mrf.mxu1 }
0x1042   :  { %v1882_v37 = vpop.f32.mrf.mxu2  ;;  %v2002_v59 = vpop.permute.xlu1 %2001 }
0x1043   :  { %v1892_v15 = vadd.f32 %v1882_v37, %v370_v54  ;;  %v3536_v60 = vadd.f32 %v2002_v59, %v1973_v11  ;;  %v338_v59 = vadd.f32 %v3254_v12, %v3000_v22 }
0x1045   :  { %2668 = vtanh.f32 %v1892_v15  ;;  %v2432_v21 = vmul.f32 -1.442695, %v1892_v15 }
0x1046   :  { %2670 = vtanh.f32 %v3536_v60 }
0x104b   :  { %v2669_v57 = vpop.eup %2668 }
0x104c   :  { %v2671_v36 = vpop.eup %2670  ;;  %1987 = vrot.lane.b32.xlu0 %v2669_v57, %s2729_s4 }
0x104d   :  { %2025 = vrot.lane.b32.xlu2 %v2671_v36, %s2729_s4 }
0x1067   :  { %v2004_v18 = vpop.permute.xlu2 %2003 }
0x1068   :  { %v3543_v19 = vadd.f32 %v2004_v18, %v1974_v58  ;;  %v341_v18 = vadd.f32 %v3093_v52, %v3000_v22 }
0x106a   :  { %2672 = vtanh.f32 %v3543_v19 }
0x106b   :  { %2674 = vpow2.f32 %v2431_v9 }
0x1070   :  { %v2673_v10 = vpop.eup %2672 }
0x1071   :  { %2027 = vrot.lane.b32.xlu0 %v2673_v10, %s2729_s4  ;;  %v2675_v48 = vpop.eup %2674 }
0x1072   :  { %v1907_v3 = vadd.f32 1.0, %v2675_v48 }
0x1074   :  { %2676 = vrcp.f32 %v1907_v3  ;;  %v1950_v8 = vand.u32 2147483648, %v1907_v3  ;;  %vm1944_vm1 = vweird.f32 %v1907_v3  ;;  %v1948_v28 = vand.u32 2147483647, %v1907_v3 }
0x1075   :  { %2678 = vpow2.f32 %v2432_v21  ;;  %v361_v21 = vadd.f32 %v3097_v55, %v3127_v13 }
0x1076   :  { %v1951_v7 = vor.u32 1.1754944e-38, %v1950_v8  ;;  %vm1949_vm3 = vcmp.eq.f32.partialorder %v1948_v28, 8.507059e+37 }
0x107a   :  { %v2677_v4 = vpop.eup %2676 }
0x107b   :  { %v1940_v26 = vmul.f32 %v2677_v4, %v1907_v3  ;;  %vm1945_vm15 = vweird.f32 %v2677_v4  ;;  %v2679_v50 = vpop.eup %2678 }
0x107c   :  { %vm1946_vm2 = vmor %vm1944_vm1, %vm1945_vm15  ;;  %v1908_v24 = vadd.f32 1.0, %v2679_v50 }
0x107d   :  { %v1941_v53 = vsub.f32 1.0, %v1940_v26 }
0x107e   :  { %2680 = vrcp.f32 %v1908_v24  ;;  %v1965_v49 = vand.u32 2147483648, %v1908_v24  ;;  %vm1959_vm5 = vweird.f32 %v1908_v24  ;;  %v1963_v34 = vand.u32 2147483647, %v1908_v24 }
0x107f   :  { %v1942_v27 = vmul.f32 %v2677_v4, %v1941_v53 }
0x1080   :  { %v1966_v14 = vor.u32 1.1754944e-38, %v1965_v49  ;;  %vm1964_vm7 = vcmp.eq.f32.partialorder %v1963_v34, 8.507059e+37  ;;  %v364_v49 = vadd.f32 %v3099_v56, %v3127_v13 }
0x1081   :  { %v1943_v16 = vadd.f32 %v2677_v4, %v1942_v27 }
0x1083   :  { %v1947_v20 = vsel %vm1946_vm2, %v2677_v4, %v1943_v16 }
0x1084   :  { %v1952_v38 = vsel %vm1949_vm3, %v1951_v7, %v1947_v20  ;;  %v2681_v35 = vpop.eup %2680 }
0x1085   :  { %v1955_v47 = vmul.f32 %v2681_v35, %v1908_v24  ;;  %vm1960_vm4 = vweird.f32 %v2681_v35  ;;  %v1975_v40 = vmul.f32 %v1952_v38, %v3496_v61 }
0x1086   :  { %vm1961_vm6 = vmor %vm1959_vm5, %vm1960_vm4 }
0x1087   :  { %v1956_v41 = vsub.f32 1.0, %v1955_v47 }
0x1089   :  { %v1957_v23 = vmul.f32 %v2681_v35, %v1956_v41 }
0x108b   :  { %v1958_v43 = vadd.f32 %v2681_v35, %v1957_v23 }
0x108d   :  { %v1962_v63 = vsel %vm1961_vm6, %v2681_v35, %v1958_v43 }
0x108e   :  { %v1967_v1 = vsel %vm1964_vm7, %v1966_v14, %v1962_v63 }
0x108f   :  { %v1976_v32 = vmul.f32 %v1967_v1, %v3500_v62 }
0x109e   :  { %v1986_v33 = vpop.permute.xlu0 %1985 }
0x109f   :  { %v1995_v29 = vmul.f32 %v1986_v33, %v1952_v38 }
0x10a1   :  { %2005 = vrot.lane.b32.xlu1 %v1995_v29, %s2730_s11 }
0x10a7   :  { %v2026_v2 = vpop.permute.xlu2 %2025 }
0x10a8   :  { %v2037_v5 = vmul.f32 %v2026_v2, %v3521_v42 }
0x10aa   :  { %2045 = vrot.lane.b32.xlu0 %v2037_v5, %s2730_s11 }
0x10be   :  { %v1988_v17 = vpop.permute.xlu0 %1987 }
0x10bf   :  { %v1996_v0 = vmul.f32 %v1988_v17, %v1967_v1 }
0x10c1   :  { %2007 = vrot.lane.b32.xlu1 %v1996_v0, %s2730_s11 }
0x10e3   :  { %v2028_v42 = vpop.permute.xlu0 %2027 }
0x10e4   :  { %v2038_v51 = vmul.f32 %v2028_v42, %v3525_v6 }
0x10e6   :  { %2047 = vrot.lane.b32.xlu1 %v2038_v51, %s2730_s11 }
0x1113   :  { %v2006_v44 = vpop.permute.xlu1 %2005 }
0x1114   :  { %v3554_v25 = vadd.f32 %v2006_v44, %v1975_v40 }
0x1116   :  { %2682 = vtanh.f32 %v3554_v25 }
0x111c   :  { %v2683_v39 = vpop.eup %2682  ;;  %v2046_v31 = vpop.permute.xlu0 %2045 }
0x111d   :  { %2433 = vmatmul.msk.f32.vlgmr.msra.gmra.mxu3 %vm229_vm0, %v2046_v31  ;;  %2437 = vmatmul.msk.f32.vlgmr.msrb.gmra.mxu0 %vm229_vm0, %v2046_v31 }
0x111e   :  { %2029 = vrot.lane.b32.xlu2 %v2683_v39, %s2729_s4 }
0x1133   :  { %v2008_v6 = vpop.permute.xlu1 %2007 }
0x1134   :  { %v3561_v30 = vadd.f32 %v2008_v6, %v1976_v32 }
0x1136   :  { %2684 = vtanh.f32 %v3561_v30 }
0x113c   :  { %v2685_v61 = vpop.eup %2684 }
0x113d   :  { %2031 = vrot.lane.b32.xlu2 %v2685_v61, %s2729_s4 }
0x1158   :  { %v2048_v45 = vpop.permute.xlu1 %2047 }
0x1159   :  { %2434 = vmatmul.msk.f32.gmra.mxu3 %vm229_vm0, %v2048_v45  ;;  %2438 = vmatmul.msk.f32.gmra.mxu0 %vm229_vm0, %v2048_v45 }
0x1178   :  { %v2030_v46 = vpop.permute.xlu2 %2029 }
0x1179   :  { %v2039_v54 = vmul.f32 %v2030_v46, %v1952_v38 }
0x117b   :  { %2049 = vrot.lane.b32.xlu0 %v2039_v54, %s2730_s11 }
0x1197   :  { %v2032_v11 = vpop.permute.xlu2 %2031 }
0x1198   :  { %v2040_v37 = vmul.f32 %v2032_v11, %v1967_v1 }
0x119a   :  { %v2105_v62 = vpop.f32.mrf.mxu0  ;;  %2051 = vrot.lane.b32.xlu1 %v2040_v37, %s2730_s11 }
0x11a0   :  { %v2078_v15 = vpop.f32.mrf.mxu3 }
0x11a1   :  { %v2117_v57 = vadd.f32 %v2078_v15, %v338_v59 }
0x11a3   :  { %2686 = vtanh.f32 %v2117_v57  ;;  %v2441_v4 = vmul.f32 -1.442695, %v2117_v57 }
0x11a9   :  { %v2687_v36 = vpop.eup %2686 }
0x11aa   :  { %2211 = vrot.lane.b32.xlu2 %v2687_v36, %s2729_s4 }
0x11d6   :  { %v2107_v58 = vpop.f32.mrf.mxu0 }
0x11dc   :  { %v2081_v10 = vpop.f32.mrf.mxu3 }
0x11dd   :  { %v2118_v9 = vadd.f32 %v2081_v10, %v341_v18 }
0x11df   :  { %2688 = vtanh.f32 %v2118_v9  ;;  %v2442_v8 = vmul.f32 -1.442695, %v2118_v9 }
0x11e0   :  { %2690 = vpow2.f32 %v2441_v4 }
0x11e5   :  { %v2689_v48 = vpop.eup %2688 }
0x11e6   :  { %2213 = vrot.lane.b32.xlu1 %v2689_v48, %s2729_s4  ;;  %v2691_v26 = vpop.eup %2690 }
0x11e7   :  { %v2135_v22 = vadd.f32 1.0, %v2691_v26 }
0x11e9   :  { %2692 = vrcp.f32 %v2135_v22  ;;  %v2150_v33 = vand.u32 2147483648, %v2135_v22  ;;  %vm2144_vm9 = vweird.f32 %v2135_v22  ;;  %v2148_v38 = vand.u32 2147483647, %v2135_v22 }
0x11eb   :  { %v2151_v55 = vor.u32 1.1754944e-38, %v2150_v33  ;;  %vm2149_vm11 = vcmp.eq.f32.partialorder %v2148_v38, 8.507059e+37 }
0x11ed   :  { %v2050_v3 = vpop.permute.xlu0 %2049 }
0x11ee   :  { %2435 = vmatmul.msk.f32.gmra.mxu3 %vm229_vm0, %v2050_v3  ;;  %2439 = vmatmul.msk.f32.gmra.mxu0 %vm229_vm0, %v2050_v3 }
0x11ef   :  { %v2693_v52 = vpop.eup %2692 }
0x11f0   :  { %v2140_v53 = vmul.f32 %v2693_v52, %v2135_v22  ;;  %vm2145_vm8 = vweird.f32 %v2693_v52 }
0x11f1   :  { %vm2146_vm10 = vmor %vm2144_vm9, %vm2145_vm8  ;;  %vm2284_vm9 = vcmask 523264  }
0x11f2   :  { %v2141_v27 = vsub.f32 1.0, %v2140_v53 }
0x11f4   :  { %v2142_v50 = vmul.f32 %v2693_v52, %v2141_v27 }
0x11f6   :  { %v2143_v7 = vadd.f32 %v2693_v52, %v2142_v50 }
0x11f8   :  { %v2147_v2 = vsel %vm2146_vm10, %v2693_v52, %v2143_v7  ;;  %vm2286_vm10 = vcmask 785408  }
0x11f9   :  { %v3582_v47 = vsel %vm2149_vm11, %v2151_v55, %v2147_v2 }
0x1204   :  { %v2212_v35 = vpop.permute.xlu2 %2211 }
0x1205   :  { %v2223_v41 = vmul.f32 %v2212_v35, %v3582_v47 }
0x120c   :  { %v2052_v12 = vpop.permute.xlu1 %2051 }
0x120d   :  { %2436 = vmatmul.msk.f32.gmra.mxu3 %vm229_vm0, %v2052_v12  ;;  %2440 = vmatmul.msk.f32.gmra.mxu0 %vm229_vm0, %v2052_v12 }
0x1258   :  { %v2214_v39 = vpop.permute.xlu1 %2213 }
0x126b   :  { %v2109_v16 = vpop.f32.mrf.mxu0 }
0x126c   :  { %v2121_v28 = vadd.f32 %v2109_v16, %v361_v21 }
0x126e   :  { %2694 = vtanh.f32 %v2121_v28  ;;  %v2443_v32 = vmul.f32 -1.442695, %v2121_v28  ;;  %v2203_v28 = vmul.f32 %v3582_v47, %v3536_v60 }
0x126f   :  { %2696 = vpow2.f32 %v2442_v8 }
0x1271   :  { %v2084_v20 = vpop.f32.mrf.mxu3 }
0x1274   :  { %v2695_v24 = vpop.eup %2694 }
0x1275   :  { %2215 = vrot.lane.b32.xlu0 %v2695_v24, %s2729_s4  ;;  %v2697_v29 = vpop.eup %2696 }
0x1276   :  { %v2136_v5 = vadd.f32 1.0, %v2697_v29 }
0x1278   :  { %2698 = vrcp.f32 %v2136_v5  ;;  %v2165_v51 = vand.u32 2147483648, %v2136_v5  ;;  %vm2159_vm13 = vweird.f32 %v2136_v5  ;;  %v2163_v40 = vand.u32 2147483647, %v2136_v5 }
0x127a   :  { %v2166_v31 = vor.u32 1.1754944e-38, %v2165_v51  ;;  %vm2164_vm15 = vcmp.eq.f32.partialorder %v2163_v40, 8.507059e+37 }
0x127d   :  { %2231 = vrot.lane.b32.xlu0 %v2223_v41, %s2730_s11 }
0x127e   :  { %v2699_v23 = vpop.eup %2698 }
0x127f   :  { %v2155_v43 = vmul.f32 %v2699_v23, %v2136_v5  ;;  %vm2160_vm12 = vweird.f32 %v2699_v23 }
0x1280   :  { %vm2161_vm14 = vmor %vm2159_vm13, %vm2160_vm12 }
0x1281   :  { %v2156_v34 = vsub.f32 1.0, %v2155_v43 }
0x1283   :  { %v2157_v1 = vmul.f32 %v2699_v23, %v2156_v34 }
0x1285   :  { %v2158_v0 = vadd.f32 %v2699_v23, %v2157_v1 }
0x1287   :  { %v2162_v44 = vsel %vm2161_vm14, %v2699_v23, %v2158_v0 }
0x1288   :  { %v3589_v56 = vsel %vm2164_vm15, %v2166_v31, %v2162_v44 }
0x1289   :  { %v2224_v13 = vmul.f32 %v2214_v39, %v3589_v56  ;;  %v2204_v24 = vmul.f32 %v3589_v56, %v3543_v19 }
0x128a   :  { %v2112_v63 = vpop.f32.mrf.mxu0 }
0x128b   :  { %v2122_v14 = vadd.f32 %v2112_v63, %v364_v49 }
0x128d   :  { %2700 = vtanh.f32 %v2122_v14  ;;  %v2444_v6 = vmul.f32 -1.442695, %v2122_v14 }
0x128e   :  { %2702 = vpow2.f32 %v2443_v32 }
0x128f   :  { %2704 = vpow2.f32 %v2444_v6 }
0x1290   :  { %v2086_v17 = vpop.f32.mrf.mxu3 }
0x1293   :  { %v2701_v42 = vpop.eup %2700 }
0x1294   :  { %2217 = vrot.lane.b32.xlu2 %v2701_v42, %s2729_s4  ;;  %v2703_v61 = vpop.eup %2702 }
0x1295   :  { %v2137_v45 = vadd.f32 1.0, %v2703_v61  ;;  %v2705_v46 = vpop.eup %2704 }
0x1296   :  { %v2138_v54 = vadd.f32 1.0, %v2705_v46 }
0x1297   :  { %2706 = vrcp.f32 %v2137_v45  ;;  %v2180_v18 = vand.u32 2147483648, %v2137_v45  ;;  %vm2174_vm2 = vweird.f32 %v2137_v45  ;;  %v2178_v10 = vand.u32 2147483647, %v2137_v45 }
0x1298   :  { %2708 = vrcp.f32 %v2138_v54  ;;  %v2195_v52 = vand.u32 2147483648, %v2138_v54  ;;  %vm2189_vm6 = vweird.f32 %v2138_v54  ;;  %v2193_v53 = vand.u32 2147483647, %v2138_v54 }
0x1299   :  { %v2181_v3 = vor.u32 1.1754944e-38, %v2180_v18  ;;  %vm2179_vm4 = vcmp.eq.f32.partialorder %v2178_v10, 8.507059e+37 }
0x129a   :  { %v2196_v27 = vor.u32 1.1754944e-38, %v2195_v52  ;;  %vm2194_vm8 = vcmp.eq.f32.partialorder %v2193_v53, 8.507059e+37 }
0x129c   :  { %2233 = vrot.lane.b32.xlu2 %v2224_v13, %s2730_s11 }
0x129d   :  { %v2707_v11 = vpop.eup %2706 }
0x129e   :  { %v2170_v37 = vmul.f32 %v2707_v11, %v2137_v45  ;;  %v2709_v62 = vpop.eup %2708  ;;  %vm2175_vm1 = vweird.f32 %v2707_v11 }
0x129f   :  { %v2185_v15 = vmul.f32 %v2709_v62, %v2138_v54  ;;  %vm2176_vm3 = vmor %vm2174_vm2, %vm2175_vm1  ;;  %vm2190_vm5 = vweird.f32 %v2709_v62 }
0x12a0   :  { %v2171_v59 = vsub.f32 1.0, %v2170_v37  ;;  %vm2191_vm7 = vmor %vm2189_vm6, %vm2190_vm5 }
0x12a1   :  { %v2186_v36 = vsub.f32 1.0, %v2185_v15 }
0x12a2   :  { %v2172_v57 = vmul.f32 %v2707_v11, %v2171_v59 }
0x12a3   :  { %v2187_v9 = vmul.f32 %v2709_v62, %v2186_v36 }
0x12a4   :  { %v2173_v58 = vadd.f32 %v2707_v11, %v2172_v57 }
0x12a5   :  { %v2188_v26 = vadd.f32 %v2709_v62, %v2187_v9 }
0x12a6   :  { %v2177_v48 = vsel %vm2176_vm3, %v2707_v11, %v2173_v58 }
0x12a7   :  { %v2182_v4 = vsel %vm2179_vm4, %v2181_v3, %v2177_v48  ;;  %v2192_v21 = vsel %vm2191_vm7, %v2709_v62, %v2188_v26 }
0x12a8   :  { %v2197_v8 = vsel %vm2194_vm8, %v2196_v27, %v2192_v21  ;;  %v2205_v60 = vmul.f32 %v2182_v4, %v3554_v25 }
0x12a9   :  { %v2206_v5 = vmul.f32 %v2197_v8, %v3561_v30 }
0x12e7   :  { %v2216_v12 = vpop.permute.xlu0 %2215 }
0x12e8   :  { %v2225_v22 = vmul.f32 %v2216_v12, %v2182_v4 }
0x12ea   :  { %2235 = vrot.lane.b32.xlu1 %v2225_v22, %s2730_s11 }
0x12ee   :  { %v2218_v16 = vpop.permute.xlu2 %2217 }
0x12ef   :  { %v2226_v50 = vmul.f32 %v2218_v16, %v2197_v8  ;;  %v2232_v20 = vpop.permute.xlu0 %2231 }
0x12f0   :  { %v2243_v7 = vadd.f32 %v2232_v20, %v2203_v28 }
0x12f1   :  { %2237 = vrot.lane.b32.xlu0 %v2226_v50, %s2730_s11 }
0x12f2   :  { %2710 = vtanh.f32 %v2243_v7 }
0x12f6   :  { %v2234_v33 = vpop.permute.xlu2 %2233 }
0x12f7   :  { %v2244_v38 = vadd.f32 %v2234_v33, %v2204_v24 }
0x12f8   :  { %v2711_v29 = vpop.eup %2710 }
0x12f9   :  { %2712 = vtanh.f32 %v2244_v38  ;;  %2255 = vrot.lane.b32.xlu1 %v2711_v29, %s2729_s4 }
0x12ff   :  { %v2713_v2 = vpop.eup %2712 }
0x1300   :  { %2257 = vrot.lane.b32.xlu0 %v2713_v2, %s2729_s4 }
0x135c   :  { %v2236_v55 = vpop.permute.xlu1 %2235 }
0x135d   :  { %v2245_v35 = vadd.f32 %v2236_v55, %v2205_v60 }
0x135f   :  { %2714 = vtanh.f32 %v2245_v35 }
0x1363   :  { %v2238_v41 = vpop.permute.xlu0 %2237 }
0x1364   :  { %v2246_v23 = vadd.f32 %v2238_v41, %v2206_v5 }
0x1365   :  { %v2715_v43 = vpop.eup %2714 }
0x1366   :  { %2716 = vtanh.f32 %v2246_v23  ;;  %2259 = vrot.lane.b32.xlu2 %v2715_v43, %s2729_s4 }
0x136b   :  { %v2256_v19 = vpop.permute.xlu1 %2255 }
0x136c   :  { %v2717_v49 = vpop.eup %2716  ;;  %v2267_v34 = vmul.f32 %v2256_v19, %v3582_v47 }
0x136d   :  { %2261 = vrot.lane.b32.xlu1 %v2717_v49, %s2729_s4 }
0x136e   :  { %2272 = vrot.lane.b32.xlu2 %v2267_v34, %s2730_s11 }
0x1372   :  { %v2258_v25 = vpop.permute.xlu0 %2257 }
0x1373   :  { %v2268_v63 = vmul.f32 %v2258_v25, %v3589_v56 }
0x1375   :  { %2280 = vrot.lane.b32.xlu1 %v2268_v63, %s2731_s3 }
0x13c0   :  { %v2260_v30 = vpop.permute.xlu2 %2259 }
0x13c1   :  { %v2269_v14 = vmul.f32 %v2260_v30, %v2182_v4 }
0x13c3   :  { %2276 = vrot.lane.b32.xlu0 %v2269_v14, %s2729_s4 }
0x13c8   :  { %v2273_v17 = vpop.permute.xlu2 %2272 }
0x13df   :  { %v2262_v1 = vpop.permute.xlu1 %2261 }
0x13e0   :  { %v2270_v42 = vmul.f32 %v2262_v1, %v2197_v8 }
0x13e7   :  { %v2281_v47 = vpop.permute.xlu1 %2280 }
0x1435   :  { %v2277_v0 = vpop.permute.xlu0 %2276 }
0x1436   :  { %v2283_v51 = vsel %vm229_vm0, %v2273_v17, %v2277_v0 }
0x1437   :  { %v2285_v40 = vsel %vm2284_vm9, %v2283_v51, %v2281_v47 }
0x1438   :  { %v2287_v44 = vsel %vm2286_vm10, %v2285_v40, %v2270_v42 }
0x1439   :  { %2288 = vst [vmem:[%s3618_s5] sm:$0xff] %v2287_v44 }

</bundles_post_ra>
